<compile_context>
chip_gen: v5e
topology: v5e:2x2
jax: 0.10.0
libtpu: 0.0.40
codegen_flags: <defaults>
</compile_context>

<pallas_src>
from functools import partial
import math
import re

import jax
import jax.numpy as jnp
from jax import lax
from jax.experimental import pallas as pl
from jax.experimental.pallas import tpu as pltpu

EPS = 1e-5  # torch.nn.LayerNorm default


# ----------------------------------------------------------------------------
# helpers
# ----------------------------------------------------------------------------
def _layernorm(x, gamma, beta):
    # single fused pass: var = E[x^2] - mu^2 (one XLU reduction saved)
    mu = jnp.mean(x, axis=-1, keepdims=True)
    ms = jnp.mean(x * x, axis=-1, keepdims=True)
    var = ms - mu * mu
    return (x - mu) * lax.rsqrt(var + EPS) * gamma + beta


def _gelu_exact(x):
    return 0.5 * x * (1.0 + lax.erf(x * (1.0 / math.sqrt(2.0))))


def _tpu_generation():
    try:
        kind = jax.devices()[0].device_kind
    except Exception:
        return 0
    m = re.search(r"(\d+)", kind)
    return int(m.group(1)) if m else 0


def _vmem_limit_bytes(generation):
    cap = None
    try:
        cap = int(pltpu.get_tpu_info().vmem_capacity_bytes)
    except Exception:
        cap = None
    if not cap or cap <= 0:
        cap = (64 if generation >= 7 else 128) * 1024 * 1024
    return (cap * 3) // 4          # ~75%: leave headroom for compiler scratch


def _pick_tile(n, target):
    """Largest multiple-of-8 divisor of n that is <= target (else full axis)."""
    if n <= target:
        return n
    for t in range(target, 7, -1):
        if n % t == 0 and t % 8 == 0:
            return t
    return n


# ----------------------------------------------------------------------------
# Kernel 1: norm1 -> qkv projection (bf16 MXU) -> head-major relayout.
# Q is pre-scaled by 1/sqrt(D); the relayout is done ONCE here (not per query
# tile in kernel 2).
# ----------------------------------------------------------------------------
def qkv_kernel(x_ref, g1_ref, b1_ref, wqkv_ref, q_ref, k_ref, v_ref, *,
               dim, num_heads, scale):
    x = x_ref[0].astype(jnp.float32)                               # (TR, C)
    tr = x.shape[0]
    d = dim // num_heads
    xn = _layernorm(x, g1_ref[0], b1_ref[0]).astype(jnp.bfloat16)
    # TODO(synk): add qkv bias here if a checkpoint uses qkv_bias=True.
    qkv = jnp.dot(xn, wqkv_ref[...],
                  preferred_element_type=jnp.float32)              # (TR, 3C)

    def head_major(block_bf16):                                    # (TR,C)->(H,TR,D)
        return jnp.transpose(block_bf16.reshape(tr, num_heads, d), (1, 0, 2))

    q_ref[0] = head_major((qkv[:, :dim] * scale).astype(jnp.bfloat16))
    k_ref[0] = head_major(qkv[:, dim:2 * dim].astype(jnp.bfloat16))
    v_ref[0] = head_major(qkv[:, 2 * dim:].astype(jnp.bfloat16))


# ----------------------------------------------------------------------------
# Kernel 2: multi-head attention (+ optional attn map) -> proj -> residual
#           -> norm2 -> MLP -> residual, per (batch, query tile).
# ----------------------------------------------------------------------------
def attn_mlp_kernel(x_ref, q_ref, k_ref, v_ref, wproj_ref, bproj_ref,
                    g2_ref, b2_ref, wfc1_ref, bfc1_ref, wfc2_ref, bfc2_ref,
                    out_ref, attn_ref=None, *, exp_dtype):
    x = x_ref[0].astype(jnp.float32)           # (TQ, C) residual rows
    tq, c = x.shape

    qh = q_ref[0]                              # (H, TQ, D) bf16, pre-scaled
    kh = k_ref[0]                              # (H, N, D)  bf16, full sequence
    vh = v_ref[0]                              # (H, N, D)  bf16

    # all heads in one batched MXU call; K consumed untransposed
    s = jnp.einsum("hqd,hkd->hqk", qh, kh,
                   preferred_element_type=jnp.float32)   # (H, TQ, N) f32
    s = s - jnp.max(s, axis=-1, keepdims=True)
    p = jnp.exp(s.astype(exp_dtype))                     # bf16 EUP on v6e/v7x
    l = jnp.sum(p.astype(jnp.float32), axis=-1, keepdims=True)
    inv = pl.reciprocal(l, approx=True)                  # (H, TQ, 1) f32

    if attn_ref is not None:                   # only materialize when requested
        attn_ref[0] = (p * inv).astype(attn_ref.dtype)

    # unnormalised PV matmul; apply 1/denominator to the small (H,TQ,D) output
    o = jnp.einsum("hqk,hkd->hqd", p.astype(jnp.bfloat16), vh,
                   preferred_element_type=jnp.float32)
    o = o * inv
    # head merge (bf16 relayout, once per tile) + single large-K projection.
    # TODO(synk): replace with 'hqd,hdc->qc' fold when Mosaic supports it.
    o = jnp.transpose(o.astype(jnp.bfloat16), (1, 0, 2)).reshape(tq, c)
    proj = jnp.dot(o, wproj_ref[...], preferred_element_type=jnp.float32) + bproj_ref[0]
    x1 = x + proj                              # residual 1 (f32)

    # MLP fused in-kernel so x1 never round-trips HBM
    xn2 = _layernorm(x1, g2_ref[0], b2_ref[0]).astype(jnp.bfloat16)
    hmid = jnp.dot(xn2, wfc1_ref[...], preferred_element_type=jnp.float32) + bfc1_ref[0]
    hmid = _gelu_exact(hmid).astype(jnp.bfloat16)
    y = jnp.dot(hmid, wfc2_ref[...], preferred_element_type=jnp.float32) + bfc2_ref[0]

    out_ref[0] = (x1 + y).astype(out_ref.dtype)


# ----------------------------------------------------------------------------
# One-time parameter preparation (persistent bf16 weight copies).
# Call this ONCE per model, outside the per-step forward.
# ----------------------------------------------------------------------------
def prepare_params(params):
    f32 = jnp.float32
    bf16 = jnp.bfloat16
    return {
        "g1": params["g1"].astype(f32), "b1": params["b1"].astype(f32),
        "g2": params["g2"].astype(f32), "b2": params["b2"].astype(f32),
        "b_proj": params["b_proj"].astype(f32),
        "b_fc1": params["b_fc1"].astype(f32),
        "b_fc2": params["b_fc2"].astype(f32),
        "w_qkv": params["w_qkv"].astype(bf16),
        "w_proj": params["w_proj"].astype(bf16),
        "w_fc1": params["w_fc1"].astype(bf16),
        "w_fc2": params["w_fc2"].astype(bf16),
    }


# ----------------------------------------------------------------------------
# Python wrapper
# ----------------------------------------------------------------------------
def attblock_threetrack_forward(x, global_index_template, global_index_search,
                                prepared, *, num_heads, return_attn=True,
                                attn_dtype=jnp.float32,
                                block_rows=256, block_q=None):
    B, N, C = x.shape
    D = C // num_heads
    scale = D ** -0.5
    Hm = prepared["w_fc1"].shape[1]

    gen = _tpu_generation()
    vmem_limit = _vmem_limit_bytes(gen)
    # v7x: smaller query tile when the (H,TQ,N) attn block is materialised so
    # the working set fits 64 MiB VMEM; elsewhere keep TQ >= 256 for MXU M-dim.
    if block_q is None:
        block_q = 128 if (gen >= 7 and return_attn) else 256
    exp_dtype = jnp.bfloat16 if gen >= 6 else jnp.float32   # bf16 EUP on v6e/v7x

    TR = _pick_tile(N, block_rows)
    TQ = _pick_tile(N, block_q)
    # grid-occupancy: dual-TC chips want >=2 points per core; others >=2 total
    min_points = 4 if gen >= 7 else 2
    while B * (N // TR) < min_points and TR >= 16 and TR % 16 == 0:
        TR //= 2
    while B * (N // TQ) < min_points and TQ >= 16 and TQ % 16 == 0:
        TQ //= 2

    cparams = pltpu.CompilerParams(
        dimension_semantics=("parallel", "parallel"),
        vmem_limit_bytes=vmem_limit)

    def run(single_buffer, exp_dt):
        def inv_spec(shape):
            idx = lambda b, i: (0,) * len(shape)
            if single_buffer:       # grid-invariant -> no need to double-buffer
                return pl.BlockSpec(shape, idx, pipeline_mode=pl.Buffered(1))
            return pl.BlockSpec(shape, idx)

        def kv_spec():
            idx = lambda b, i: (b, 0, 0, 0)   # full sequence, invariant in i
            if single_buffer:
                return pl.BlockSpec((1, num_heads, N, D), idx,
                                    pipeline_mode=pl.Buffered(1))
            return pl.BlockSpec((1, num_heads, N, D), idx)

        # ---- kernel 1: norm1 + qkv + head-major relayout ----
        q_h, k_h, v_h = pl.pallas_call(
            partial(qkv_kernel, dim=C, num_heads=num_heads, scale=scale),
            out_shape=tuple(jax.ShapeDtypeStruct((B, num_heads, N, D), jnp.bfloat16)
                            for _ in range(3)),
            grid=(B, N // TR),
            in_specs=[
                pl.BlockSpec((1, TR, C), lambda b, i: (b, i, 0)),
                inv_spec((1, C)), inv_spec((1, C)),        # norm1 gamma / beta
                inv_spec((C, 3 * C)),                      # qkv weight (bf16)
            ],
            out_specs=tuple(pl.BlockSpec((1, num_heads, TR, D),
                                         lambda b, i: (b, 0, i, 0))
                            for _ in range(3)),
            compiler_params=cparams,
        )(x, prepared["g1"], prepared["b1"], prepared["w_qkv"])

        # ---- kernel 2: attention + proj + residual + norm2 + MLP + residual ----
        in_specs = [
            pl.BlockSpec((1, TQ, C), lambda b, i: (b, i, 0)),                # residual x rows
            pl.BlockSpec((1, num_heads, TQ, D), lambda b, i: (b, 0, i, 0)),  # Q (head-major)
            kv_spec(), kv_spec(),                                            # K / V (head-major)
            inv_spec((C, C)), inv_spec((1, C)),                              # proj w / b
            inv_spec((1, C)), inv_spec((1, C)),                              # norm2 gamma / beta
            inv_spec((C, Hm)), inv_spec((1, Hm)),                            # fc1 w / b
            inv_spec((Hm, C)), inv_spec((1, C)),                             # fc2 w / b
        ]
        args = (x, q_h, k_h, v_h,
                prepared["w_proj"], prepared["b_proj"],
                prepared["g2"], prepared["b2"],
                prepared["w_fc1"], prepared["b_fc1"],
                prepared["w_fc2"], prepared["b_fc2"])

        if return_attn:
            out_shape = (jax.ShapeDtypeStruct((B, N, C), x.dtype),
                         jax.ShapeDtypeStruct((B, num_heads, N, N), attn_dtype))
            out_specs = (pl.BlockSpec((1, TQ, C), lambda b, i: (b, i, 0)),
                         pl.BlockSpec((1, num_heads, TQ, N),
                                      lambda b, i: (b, 0, i, 0)))
        else:
            out_shape = jax.ShapeDtypeStruct((B, N, C), x.dtype)
            out_specs = pl.BlockSpec((1, TQ, C), lambda b, i: (b, i, 0))

        return pl.pallas_call(
            partial(attn_mlp_kernel, exp_dtype=exp_dt),
            out_shape=out_shape,
            grid=(B, N // TQ),
            in_specs=in_specs,
            out_specs=out_specs,
            compiler_params=cparams,
        )(*args)

    try:
        outs = run(True, exp_dtype)
    except Exception:
        # graceful degradation if pl.Buffered(1) / bf16 exp is unsupported by
        # this jax / Mosaic build
        outs = run(False, jnp.float32)

    if return_attn:
        x_out, attn = outs
    else:
        x_out, attn = outs, None

    removed_index_search = None  # keep_ratio_search == 1.0 -> elimination skipped
    return (x_out, global_index_template, global_index_search,
            removed_index_search, attn)


# ----------------------------------------------------------------------------
# Pure-JAX reference (f32) for correctness check
# ----------------------------------------------------------------------------
def reference_forward(x, params, *, num_heads):
    B, N, C = x.shape
    D = C // num_heads
    scale = D ** -0.5
    xn = _layernorm(x.astype(jnp.float32), params["g1"][0], params["b1"][0])
    qkv = xn @ params["w_qkv"]
    qkv = qkv.reshape(B, N, 3, num_heads, D).transpose(2, 0, 3, 1, 4)
    q, k, v = qkv[0], qkv[1], qkv[2]
    attn = jax.nn.softmax(jnp.einsum("bhnd,bhmd->bhnm", q, k) * scale, axis=-1)
    o = jnp.einsum("bhnm,bhmd->bhnd", attn, v).transpose(0, 2, 1, 3).reshape(B, N, C)
    x = x + o @ params["w_proj"] + params["b_proj"][0]
    xn2 = _layernorm(x, params["g2"][0], params["b2"][0])
    h = _gelu_exact(xn2 @ params["w_fc1"] + params["b_fc1"][0])
    x = x + h @ params["w_fc2"] + params["b_fc2"][0]
    return x, attn


if __name__ == "__main__":
    # Small, module-consistent shapes: dim=32, heads=4, mlp_ratio=4, seq=8, batch=2
    B, N, C, H = 2, 8, 32, 4
    Hm = int(C * 4.0)
    lens_t, lens_s = 3, 5  # N = lens_t + lens_s

    key = jax.random.PRNGKey(0)
    ks = jax.random.split(key, 8)

    params = {
        "g1": jnp.ones((1, C), jnp.float32),
        "b1": jnp.zeros((1, C), jnp.float32),
        "w_qkv": 0.05 * jax.random.normal(ks[0], (C, 3 * C), jnp.float32),
        "w_proj": 0.05 * jax.random.normal(ks[1], (C, C), jnp.float32),
        "b_proj": 0.01 * jax.random.normal(ks[2], (1, C), jnp.float32),
        "g2": jnp.ones((1, C), jnp.float32),
        "b2": jnp.zeros((1, C), jnp.float32),
        "w_fc1": 0.05 * jax.random.normal(ks[3], (C, Hm), jnp.float32),
        "b_fc1": 0.01 * jax.random.normal(ks[4], (1, Hm), jnp.float32),
        "w_fc2": 0.05 * jax.random.normal(ks[5], (Hm, C), jnp.float32),
        "b_fc2": 0.01 * jax.random.normal(ks[6], (1, C), jnp.float32),
    }

    x = jax.random.normal(ks[7], (B, N, C), jnp.float32)
    gidx_t = jnp.tile(jnp.arange(lens_t, dtype=jnp.int32)[None], (B, 1))
    gidx_s = jnp.tile(jnp.arange(lens_s, dtype=jnp.int32)[None], (B, 1))

    # one-time persistent bf16 weight copies (not per forward call)
    prepared = prepare_params(params)
    prepared = jax.block_until_ready(prepared)

    # default path (module semantics: f32 attn map is returned)
    out = attblock_threetrack_forward(x, gidx_t, gidx_s, prepared, num_heads=H)
    x_out, gt, gs, removed, attn = jax.block_until_ready(out)

    x_ref, attn_ref = reference_forward(x, params, num_heads=H)
    assert x_out.shape == (B, N, C) and attn.shape == (B, H, N, N)
    assert removed is None
    # bf16 matmul operands (f32 accumulation) -> slightly looser tolerance
    assert jnp.allclose(x_out, x_ref, rtol=1e-2, atol=1e-2), "x mismatch"
    assert jnp.allclose(attn, attn_ref, rtol=1e-2, atol=1e-2), "attn mismatch"

    # bandwidth-saving path: skip materializing the (B, H, N, N) attention map
    out2 = attblock_threetrack_forward(x, gidx_t, gidx_s, prepared, num_heads=H,
                                       return_attn=False)
    out2 = jax.block_until_ready(out2)
    assert out2[4] is None
    assert jnp.allclose(out2[0], x_ref, rtol=1e-2, atol=1e-2), "x (no-attn) mismatch"

    # bf16 attention-map path (halves the largest HBM store of the layer)
    out3 = attblock_threetrack_forward(x, gidx_t, gidx_s, prepared, num_heads=H,
                                       attn_dtype=jnp.bfloat16)
    out3 = jax.block_until_ready(out3)
    assert out3[4].dtype == jnp.bfloat16
    assert jnp.allclose(out3[4].astype(jnp.float32), attn_ref,
                        rtol=3e-2, atol=3e-2), "attn (bf16) mismatch"

    print("KERNEL_OK")
</pallas_src>

<mosaic_0001>
module attributes {stable_mosaic.version = 11 : i64} {
  func.func @qkv_kernel(%arg0: i32, %arg1: i32, %arg2: memref<1x8x32xf32, #tpu.memory_space<vmem>>, %arg3: memref<1x32xf32, #tpu.memory_space<vmem>>, %arg4: memref<1x32xf32, #tpu.memory_space<vmem>>, %arg5: memref<32x96xbf16, #tpu.memory_space<vmem>>, %arg6: memref<1x4x8x8xbf16, #tpu.memory_space<vmem>>, %arg7: memref<1x4x8x8xbf16, #tpu.memory_space<vmem>>, %arg8: memref<1x4x8x8xbf16, #tpu.memory_space<vmem>>) attributes {dimension_semantics = [#tpu.dimension_semantics<parallel>, #tpu.dimension_semantics<parallel>], iteration_bounds = array<i64: 2, 1>, scalar_prefetch = 0 : i64, scratch_operands = 0 : i64, tpu.core_type = #tpu.core_type<tc>, window_params = [{transform_indices = @transform_0, window_bounds = array<i64: 1, 8, 32>}, {pipeline_mode = #tpu.pipeline_mode<synchronous>, transform_indices = @transform_1, window_bounds = array<i64: 1, 32>}, {pipeline_mode = #tpu.pipeline_mode<synchronous>, transform_indices = @transform_2, window_bounds = array<i64: 1, 32>}, {pipeline_mode = #tpu.pipeline_mode<synchronous>, transform_indices = @transform_3, window_bounds = array<i64: 32, 96>}, {transform_indices = @transform_4, window_bounds = array<i64: 1, 4, 8, 8>}, {transform_indices = @transform_5, window_bounds = array<i64: 1, 4, 8, 8>}, {transform_indices = @transform_6, window_bounds = array<i64: 1, 4, 8, 8>}]} {
    %c0 = arith.constant 0 : index
    %c0_0 = arith.constant 0 : index
    %c0_1 = arith.constant 0 : index
    %0 = vector.load %arg2[%c0, %c0_0, %c0_1] : memref<1x8x32xf32, #tpu.memory_space<vmem>>, vector<1x8x32xf32>
    %1 = vector.shape_cast %0 : vector<1x8x32xf32> to vector<8x32xf32>
    %c0_2 = arith.constant 0 : index
    %c0_3 = arith.constant 0 : index
    %2 = vector.load %arg3[%c0_2, %c0_3] : memref<1x32xf32, #tpu.memory_space<vmem>>, vector<1x32xf32>
    %3 = vector.shape_cast %2 : vector<1x32xf32> to vector<32xf32>
    %c0_4 = arith.constant 0 : index
    %c0_5 = arith.constant 0 : index
    %4 = vector.load %arg4[%c0_4, %c0_5] : memref<1x32xf32, #tpu.memory_space<vmem>>, vector<1x32xf32>
    %5 = vector.shape_cast %4 : vector<1x32xf32> to vector<32xf32>
    %cst = arith.constant dense<0.000000e+00> : vector<8xf32>
    %6 = vector.multi_reduction <add>, %1, %cst [1] : vector<8x32xf32> to vector<8xf32>
    %7 = vector.shape_cast %6 : vector<8xf32> to vector<8x1xf32>
    %cst_6 = arith.constant 3.200000e+01 : f32
    %8 = vector.broadcast %cst_6 : f32 to vector<8x1xf32>
    %9 = arith.divf %7, %8 : vector<8x1xf32>
    %10 = arith.mulf %1, %1 : vector<8x32xf32>
    %cst_7 = arith.constant dense<0.000000e+00> : vector<8xf32>
    %11 = vector.multi_reduction <add>, %10, %cst_7 [1] : vector<8x32xf32> to vector<8xf32>
    %12 = vector.shape_cast %11 : vector<8xf32> to vector<8x1xf32>
    %cst_8 = arith.constant 3.200000e+01 : f32
    %13 = vector.broadcast %cst_8 : f32 to vector<8x1xf32>
    %14 = arith.divf %12, %13 : vector<8x1xf32>
    %15 = arith.mulf %9, %9 : vector<8x1xf32>
    %16 = arith.subf %14, %15 : vector<8x1xf32>
    %17 = vector.broadcast %9 : vector<8x1xf32> to vector<8x32xf32>
    %18 = arith.subf %1, %17 : vector<8x32xf32>
    %cst_9 = arith.constant 9.99999974E-6 : f32
    %19 = vector.broadcast %cst_9 : f32 to vector<8x1xf32>
    %20 = arith.addf %16, %19 : vector<8x1xf32>
    %21 = math.rsqrt %20 : vector<8x1xf32>
    %22 = vector.broadcast %21 : vector<8x1xf32> to vector<8x32xf32>
    %23 = arith.mulf %18, %22 : vector<8x32xf32>
    %24 = vector.shape_cast %3 : vector<32xf32> to vector<1x32xf32>
    %25 = vector.broadcast %24 : vector<1x32xf32> to vector<8x32xf32>
    %26 = arith.mulf %23, %25 : vector<8x32xf32>
    %27 = vector.shape_cast %5 : vector<32xf32> to vector<1x32xf32>
    %28 = vector.broadcast %27 : vector<1x32xf32> to vector<8x32xf32>
    %29 = arith.addf %26, %28 : vector<8x32xf32>
    %30 = arith.truncf %29 : vector<8x32xf32> to vector<8x32xbf16>
    %c0_10 = arith.constant 0 : index
    %c0_11 = arith.constant 0 : index
    %31 = vector.load %arg5[%c0_10, %c0_11] : memref<32x96xbf16, #tpu.memory_space<vmem>>, vector<32x96xbf16>
    %cst_12 = arith.constant dense<0.000000e+00> : vector<8x96xf32>
    %32 = tpu.matmul %30, %31, %cst_12 {dimension_numbers = #tpu.dot_dimension_numbers<[1], [0], [0], [1], [0, 0, 1, 1], [], []>} : vector<8x32xbf16>, vector<32x96xbf16>, vector<8x96xf32> -> vector<8x96xf32>
    %33 = vector.extract_strided_slice %32 {offsets = [0, 0], sizes = [8, 32], strides = [1, 1]} : vector<8x96xf32> to vector<8x32xf32>
    %cst_13 = arith.constant 0.353553385 : f32
    %34 = vector.broadcast %cst_13 : f32 to vector<8x32xf32>
    %35 = arith.mulf %33, %34 : vector<8x32xf32>
    %36 = arith.truncf %35 : vector<8x32xf32> to vector<8x32xbf16>
    %37 = vector.shape_cast %36 : vector<8x32xbf16> to vector<8x4x8xbf16>
    %38 = tpu.transpose %37, [1, 0, 2] : vector<8x4x8xbf16> -> vector<4x8x8xbf16>
    %c0_14 = arith.constant 0 : index
    %c0_15 = arith.constant 0 : index
    %c0_16 = arith.constant 0 : index
    %c0_17 = arith.constant 0 : index
    %39 = vector.load %arg6[%c0_14, %c0_15, %c0_16, %c0_17] : memref<1x4x8x8xbf16, #tpu.memory_space<vmem>>, vector<1x4x8x8xbf16>
    %40 = vector.shape_cast %39 : vector<1x4x8x8xbf16> to vector<4x8x8xbf16>
    %41 = vector.shape_cast %38 : vector<4x8x8xbf16> to vector<1x4x8x8xbf16>
    tpu.vector_store %arg6[%c0_14, %c0_15, %c0_16, %c0_17], %41 {strides = array<i32>} : memref<1x4x8x8xbf16, #tpu.memory_space<vmem>>, vector<1x4x8x8xbf16>,
    %42 = vector.extract_strided_slice %32 {offsets = [0, 32], sizes = [8, 32], strides = [1, 1]} : vector<8x96xf32> to vector<8x32xf32>
    %43 = arith.truncf %42 : vector<8x32xf32> to vector<8x32xbf16>
    %44 = vector.shape_cast %43 : vector<8x32xbf16> to vector<8x4x8xbf16>
    %45 = tpu.transpose %44, [1, 0, 2] : vector<8x4x8xbf16> -> vector<4x8x8xbf16>
    %c0_18 = arith.constant 0 : index
    %c0_19 = arith.constant 0 : index
    %c0_20 = arith.constant 0 : index
    %c0_21 = arith.constant 0 : index
    %46 = vector.load %arg7[%c0_18, %c0_19, %c0_20, %c0_21] : memref<1x4x8x8xbf16, #tpu.memory_space<vmem>>, vector<1x4x8x8xbf16>
    %47 = vector.shape_cast %46 : vector<1x4x8x8xbf16> to vector<4x8x8xbf16>
    %48 = vector.shape_cast %45 : vector<4x8x8xbf16> to vector<1x4x8x8xbf16>
    tpu.vector_store %arg7[%c0_18, %c0_19, %c0_20, %c0_21], %48 {strides = array<i32>} : memref<1x4x8x8xbf16, #tpu.memory_space<vmem>>, vector<1x4x8x8xbf16>,
    %49 = vector.extract_strided_slice %32 {offsets = [0, 64], sizes = [8, 32], strides = [1, 1]} : vector<8x96xf32> to vector<8x32xf32>
    %50 = arith.truncf %49 : vector<8x32xf32> to vector<8x32xbf16>
    %51 = vector.shape_cast %50 : vector<8x32xbf16> to vector<8x4x8xbf16>
    %52 = tpu.transpose %51, [1, 0, 2] : vector<8x4x8xbf16> -> vector<4x8x8xbf16>
    %c0_22 = arith.constant 0 : index
    %c0_23 = arith.constant 0 : index
    %c0_24 = arith.constant 0 : index
    %c0_25 = arith.constant 0 : index
    %53 = vector.load %arg8[%c0_22, %c0_23, %c0_24, %c0_25] : memref<1x4x8x8xbf16, #tpu.memory_space<vmem>>, vector<1x4x8x8xbf16>
    %54 = vector.shape_cast %53 : vector<1x4x8x8xbf16> to vector<4x8x8xbf16>
    %55 = vector.shape_cast %52 : vector<4x8x8xbf16> to vector<1x4x8x8xbf16>
    tpu.vector_store %arg8[%c0_22, %c0_23, %c0_24, %c0_25], %55 {strides = array<i32>} : memref<1x4x8x8xbf16, #tpu.memory_space<vmem>>, vector<1x4x8x8xbf16>,
    return
  }
  func.func @transform_0(%arg0: i32, %arg1: i32) -> (i32, i32, i32) {
    %c0_i32 = arith.constant 0 : i32
    %c0_i32_0 = arith.constant 0 : i32
    return %arg0, %arg1, %c0_i32 : i32, i32, i32
  }
  func.func @transform_1(%arg0: i32, %arg1: i32) -> (i32, i32) {
    %c0_i32 = arith.constant 0 : i32
    %c0_i32_0 = arith.constant 0 : i32
    %c0_i32_1 = arith.constant 0 : i32
    return %c0_i32, %c0_i32_0 : i32, i32
  }
  func.func @transform_2(%arg0: i32, %arg1: i32) -> (i32, i32) {
    %c0_i32 = arith.constant 0 : i32
    %c0_i32_0 = arith.constant 0 : i32
    %c0_i32_1 = arith.constant 0 : i32
    return %c0_i32, %c0_i32_0 : i32, i32
  }
  func.func @transform_3(%arg0: i32, %arg1: i32) -> (i32, i32) {
    %c0_i32 = arith.constant 0 : i32
    %c0_i32_0 = arith.constant 0 : i32
    %c0_i32_1 = arith.constant 0 : i32
    return %c0_i32, %c0_i32_0 : i32, i32
  }
  func.func @transform_4(%arg0: i32, %arg1: i32) -> (i32, i32, i32, i32) {
    %c0_i32 = arith.constant 0 : i32
    %c0_i32_0 = arith.constant 0 : i32
    %c0_i32_1 = arith.constant 0 : i32
    return %arg0, %c0_i32, %arg1, %c0_i32_0 : i32, i32, i32, i32
  }
  func.func @transform_5(%arg0: i32, %arg1: i32) -> (i32, i32, i32, i32) {
    %c0_i32 = arith.constant 0 : i32
    %c0_i32_0 = arith.constant 0 : i32
    %c0_i32_1 = arith.constant 0 : i32
    return %arg0, %c0_i32, %arg1, %c0_i32_0 : i32, i32, i32, i32
  }
  func.func @transform_6(%arg0: i32, %arg1: i32) -> (i32, i32, i32, i32) {
    %c0_i32 = arith.constant 0 : i32
    %c0_i32_0 = arith.constant 0 : i32
    %c0_i32_1 = arith.constant 0 : i32
    return %arg0, %c0_i32, %arg1, %c0_i32_0 : i32, i32, i32, i32
  }
}

module attributes {stable_mosaic.version = 11 : i64} {
  func.func @qkv_kernel(%arg0: i32, %arg1: i32, %arg2: memref<1x8x32xf32, #tpu.memory_space<vmem>>, %arg3: memref<1x32xf32, #tpu.memory_space<vmem>>, %arg4: memref<1x32xf32, #tpu.memory_space<vmem>>, %arg5: memref<32x96xbf16, #tpu.memory_space<vmem>>, %arg6: memref<1x4x8x8xbf16, #tpu.memory_space<vmem>>, %arg7: memref<1x4x8x8xbf16, #tpu.memory_space<vmem>>, %arg8: memref<1x4x8x8xbf16, #tpu.memory_space<vmem>>) attributes {dimension_semantics = [#tpu.dimension_semantics<parallel>, #tpu.dimension_semantics<parallel>], iteration_bounds = array<i64: 2, 1>, scalar_prefetch = 0 : i64, scratch_operands = 0 : i64, tpu.core_type = #tpu.core_type<tc>, window_params = [{transform_indices = @transform_0, window_bounds = array<i64: 1, 8, 32>}, {pipeline_mode = #tpu.pipeline_mode<synchronous>, transform_indices = @transform_1, window_bounds = array<i64: 1, 32>}, {pipeline_mode = #tpu.pipeline_mode<synchronous>, transform_indices = @transform_2, window_bounds = array<i64: 1, 32>}, {pipeline_mode = #tpu.pipeline_mode<synchronous>, transform_indices = @transform_3, window_bounds = array<i64: 32, 96>}, {transform_indices = @transform_4, window_bounds = array<i64: 1, 4, 8, 8>}, {transform_indices = @transform_5, window_bounds = array<i64: 1, 4, 8, 8>}, {transform_indices = @transform_6, window_bounds = array<i64: 1, 4, 8, 8>}]} {
    %c0 = arith.constant 0 : index
    %c0_0 = arith.constant 0 : index
    %c0_1 = arith.constant 0 : index
    %0 = vector.load %arg2[%c0, %c0_0, %c0_1] : memref<1x8x32xf32, #tpu.memory_space<vmem>>, vector<1x8x32xf32>
    %1 = vector.shape_cast %0 : vector<1x8x32xf32> to vector<8x32xf32>
    %c0_2 = arith.constant 0 : index
    %c0_3 = arith.constant 0 : index
    %2 = vector.load %arg3[%c0_2, %c0_3] : memref<1x32xf32, #tpu.memory_space<vmem>>, vector<1x32xf32>
    %3 = vector.shape_cast %2 : vector<1x32xf32> to vector<32xf32>
    %c0_4 = arith.constant 0 : index
    %c0_5 = arith.constant 0 : index
    %4 = vector.load %arg4[%c0_4, %c0_5] : memref<1x32xf32, #tpu.memory_space<vmem>>, vector<1x32xf32>
    %5 = vector.shape_cast %4 : vector<1x32xf32> to vector<32xf32>
    %cst = arith.constant dense<0.000000e+00> : vector<8xf32>
    %6 = vector.multi_reduction <add>, %1, %cst [1] : vector<8x32xf32> to vector<8xf32>
    %7 = vector.shape_cast %6 : vector<8xf32> to vector<8x1xf32>
    %cst_6 = arith.constant 3.200000e+01 : f32
    %8 = vector.broadcast %cst_6 : f32 to vector<8x1xf32>
    %9 = arith.divf %7, %8 : vector<8x1xf32>
    %10 = arith.mulf %1, %1 : vector<8x32xf32>
    %cst_7 = arith.constant dense<0.000000e+00> : vector<8xf32>
    %11 = vector.multi_reduction <add>, %10, %cst_7 [1] : vector<8x32xf32> to vector<8xf32>
    %12 = vector.shape_cast %11 : vector<8xf32> to vector<8x1xf32>
    %cst_8 = arith.constant 3.200000e+01 : f32
    %13 = vector.broadcast %cst_8 : f32 to vector<8x1xf32>
    %14 = arith.divf %12, %13 : vector<8x1xf32>
    %15 = arith.mulf %9, %9 : vector<8x1xf32>
    %16 = arith.subf %14, %15 : vector<8x1xf32>
    %17 = vector.broadcast %9 : vector<8x1xf32> to vector<8x32xf32>
    %18 = arith.subf %1, %17 : vector<8x32xf32>
    %cst_9 = arith.constant 9.99999974E-6 : f32
    %19 = vector.broadcast %cst_9 : f32 to vector<8x1xf32>
    %20 = arith.addf %16, %19 : vector<8x1xf32>
    %21 = math.rsqrt %20 : vector<8x1xf32>
    %22 = vector.broadcast %21 : vector<8x1xf32> to vector<8x32xf32>
    %23 = arith.mulf %18, %22 : vector<8x32xf32>
    %24 = vector.shape_cast %3 : vector<32xf32> to vector<1x32xf32>
    %25 = vector.broadcast %24 : vector<1x32xf32> to vector<8x32xf32>
    %26 = arith.mulf %23, %25 : vector<8x32xf32>
    %27 = vector.shape_cast %5 : vector<32xf32> to vector<1x32xf32>
    %28 = vector.broadcast %27 : vector<1x32xf32> to vector<8x32xf32>
    %29 = arith.addf %26, %28 : vector<8x32xf32>
    %30 = arith.truncf %29 : vector<8x32xf32> to vector<8x32xbf16>
    %c0_10 = arith.constant 0 : index
    %c0_11 = arith.constant 0 : index
    %31 = vector.load %arg5[%c0_10, %c0_11] : memref<32x96xbf16, #tpu.memory_space<vmem>>, vector<32x96xbf16>
    %cst_12 = arith.constant dense<0.000000e+00> : vector<8x96xf32>
    %32 = tpu.matmul %30, %31, %cst_12 {dimension_numbers = #tpu.dot_dimension_numbers<[1], [0], [0], [1], [0, 0, 1, 1], [], []>} : vector<8x32xbf16>, vector<32x96xbf16>, vector<8x96xf32> -> vector<8x96xf32>
    %33 = vector.extract_strided_slice %32 {offsets = [0, 0], sizes = [8, 32], strides = [1, 1]} : vector<8x96xf32> to vector<8x32xf32>
    %cst_13 = arith.constant 0.353553385 : f32
    %34 = vector.broadcast %cst_13 : f32 to vector<8x32xf32>
    %35 = arith.mulf %33, %34 : vector<8x32xf32>
    %36 = arith.truncf %35 : vector<8x32xf32> to vector<8x32xbf16>
    %37 = vector.shape_cast %36 : vector<8x32xbf16> to vector<8x4x8xbf16>
    %38 = tpu.transpose %37, [1, 0, 2] : vector<8x4x8xbf16> -> vector<4x8x8xbf16>
    %c0_14 = arith.constant 0 : index
    %c0_15 = arith.constant 0 : index
    %c0_16 = arith.constant 0 : index
    %c0_17 = arith.constant 0 : index
    %39 = vector.load %arg6[%c0_14, %c0_15, %c0_16, %c0_17] : memref<1x4x8x8xbf16, #tpu.memory_space<vmem>>, vector<1x4x8x8xbf16>
    %40 = vector.shape_cast %39 : vector<1x4x8x8xbf16> to vector<4x8x8xbf16>
    %41 = vector.shape_cast %38 : vector<4x8x8xbf16> to vector<1x4x8x8xbf16>
    tpu.vector_store %arg6[%c0_14, %c0_15, %c0_16, %c0_17], %41 {strides = array<i32>} : memref<1x4x8x8xbf16, #tpu.memory_space<vmem>>, vector<1x4x8x8xbf16>,
    %42 = vector.extract_strided_slice %32 {offsets = [0, 32], sizes = [8, 32], strides = [1, 1]} : vector<8x96xf32> to vector<8x32xf32>
    %43 = arith.truncf %42 : vector<8x32xf32> to vector<8x32xbf16>
    %44 = vector.shape_cast %43 : vector<8x32xbf16> to vector<8x4x8xbf16>
    %45 = tpu.transpose %44, [1, 0, 2] : vector<8x4x8xbf16> -> vector<4x8x8xbf16>
    %c0_18 = arith.constant 0 : index
    %c0_19 = arith.constant 0 : index
    %c0_20 = arith.constant 0 : index
    %c0_21 = arith.constant 0 : index
    %46 = vector.load %arg7[%c0_18, %c0_19, %c0_20, %c0_21] : memref<1x4x8x8xbf16, #tpu.memory_space<vmem>>, vector<1x4x8x8xbf16>
    %47 = vector.shape_cast %46 : vector<1x4x8x8xbf16> to vector<4x8x8xbf16>
    %48 = vector.shape_cast %45 : vector<4x8x8xbf16> to vector<1x4x8x8xbf16>
    tpu.vector_store %arg7[%c0_18, %c0_19, %c0_20, %c0_21], %48 {strides = array<i32>} : memref<1x4x8x8xbf16, #tpu.memory_space<vmem>>, vector<1x4x8x8xbf16>,
    %49 = vector.extract_strided_slice %32 {offsets = [0, 64], sizes = [8, 32], strides = [1, 1]} : vector<8x96xf32> to vector<8x32xf32>
    %50 = arith.truncf %49 : vector<8x32xf32> to vector<8x32xbf16>
    %51 = vector.shape_cast %50 : vector<8x32xbf16> to vector<8x4x8xbf16>
    %52 = tpu.transpose %51, [1, 0, 2] : vector<8x4x8xbf16> -> vector<4x8x8xbf16>
    %c0_22 = arith.constant 0 : index
    %c0_23 = arith.constant 0 : index
    %c0_24 = arith.constant 0 : index
    %c0_25 = arith.constant 0 : index
    %53 = vector.load %arg8[%c0_22, %c0_23, %c0_24, %c0_25] : memref<1x4x8x8xbf16, #tpu.memory_space<vmem>>, vector<1x4x8x8xbf16>
    %54 = vector.shape_cast %53 : vector<1x4x8x8xbf16> to vector<4x8x8xbf16>
    %55 = vector.shape_cast %52 : vector<4x8x8xbf16> to vector<1x4x8x8xbf16>
    tpu.vector_store %arg8[%c0_22, %c0_23, %c0_24, %c0_25], %55 {strides = array<i32>} : memref<1x4x8x8xbf16, #tpu.memory_space<vmem>>, vector<1x4x8x8xbf16>,
    return
  }
  func.func @transform_0(%arg0: i32, %arg1: i32) -> (i32, i32, i32) {
    %c0_i32 = arith.constant 0 : i32
    %c0_i32_0 = arith.constant 0 : i32
    return %arg0, %arg1, %c0_i32 : i32, i32, i32
  }
  func.func @transform_1(%arg0: i32, %arg1: i32) -> (i32, i32) {
    %c0_i32 = arith.constant 0 : i32
    %c0_i32_0 = arith.constant 0 : i32
    %c0_i32_1 = arith.constant 0 : i32
    return %c0_i32, %c0_i32_0 : i32, i32
  }
  func.func @transform_2(%arg0: i32, %arg1: i32) -> (i32, i32) {
    %c0_i32 = arith.constant 0 : i32
    %c0_i32_0 = arith.constant 0 : i32
    %c0_i32_1 = arith.constant 0 : i32
    return %c0_i32, %c0_i32_0 : i32, i32
  }
  func.func @transform_3(%arg0: i32, %arg1: i32) -> (i32, i32) {
    %c0_i32 = arith.constant 0 : i32
    %c0_i32_0 = arith.constant 0 : i32
    %c0_i32_1 = arith.constant 0 : i32
    return %c0_i32, %c0_i32_0 : i32, i32
  }
  func.func @transform_4(%arg0: i32, %arg1: i32) -> (i32, i32, i32, i32) {
    %c0_i32 = arith.constant 0 : i32
    %c0_i32_0 = arith.constant 0 : i32
    %c0_i32_1 = arith.constant 0 : i32
    return %arg0, %c0_i32, %arg1, %c0_i32_0 : i32, i32, i32, i32
  }
  func.func @transform_5(%arg0: i32, %arg1: i32) -> (i32, i32, i32, i32) {
    %c0_i32 = arith.constant 0 : i32
    %c0_i32_0 = arith.constant 0 : i32
    %c0_i32_1 = arith.constant 0 : i32
    return %arg0, %c0_i32, %arg1, %c0_i32_0 : i32, i32, i32, i32
  }
  func.func @transform_6(%arg0: i32, %arg1: i32) -> (i32, i32, i32, i32) {
    %c0_i32 = arith.constant 0 : i32
    %c0_i32_0 = arith.constant 0 : i32
    %c0_i32_1 = arith.constant 0 : i32
    return %arg0, %c0_i32, %arg1, %c0_i32_0 : i32, i32, i32, i32
  }
}

</mosaic_0001>

<bundles_post_ra>
// kernel: tpu_custom_call.1
= control target key start
LH: loop header
LB: loop body
LE: loop exit
PB: predicated region body
PF: predicated region fallthrough
CT: control target
= control target key end

     0   :  { %s1843_s0 = inlined_call_operand.hbm [shape: f32[2,8,32], index: 0, kind: input, shape index: {}]   ;;  %s1844_s1 = inlined_call_operand.hbm [shape: f32[1,32], index: 1, kind: input, shape index: {}]   ;;  %s1845_s2 = inlined_call_operand.vmem [shape: f32[1,32], index: 2, kind: input, shape index: {}]   ;;  %s1846_s3 = inlined_call_operand.hbm [shape: bf16[32,96], index: 3, kind: input, shape index: {}]   ;;  %s1847_s4 = inlined_call_operand.hbm [shape: bf16[2,4,8,8], index: 4, kind: output, shape index: {0}]   ;;  %s1848_s5 = inlined_call_operand.hbm [shape: bf16[2,4,8,8], index: 5, kind: output, shape index: {1}]   ;;  %s1849_s6 = inlined_call_operand.hbm [shape: bf16[2,4,8,8], index: 6, kind: output, shape index: {2}]  }
   0x1   :  { %1851 = sst [smem:[#allocation16_spill]] %s1844_s1 }
   0x2   :  { %12 = vsyncpa [#allocation3], 0 }
   0x3   :  { %14 = vsyncpa [#allocation3 + $0x1], 0 }
   0x4   :  { %15 = vsyncpa [#allocation6], 0 }
   0x5   :  { %16 = vsyncpa [#allocation4], 0 }
   0x6   :  { %18 = vsyncpa [#allocation4 + $0x1], 0 }
   0x7   :  { %19 = vsyncpa [#allocation10], 0 }
   0x8   :  { %21 = vsyncpa [#allocation10 + $0x1], 0  ;;  %s1486_s21 = smov 0   ;;  %s1488_s22 = smov 0  }
   0x9   :  { %s1490_s23 = smov 0   ;;  %s1492_s24 = smov 0  }
   0xa   :  { %s1494_s25 = smov 0   ;;  %s1496_s26 = smov 0  }
   0xb LB: > { %s1517_s27 = sadd.s32 4294967295, %s1436_s26   ;;  %s1850_s28 = sadd.s32 4294967294, %s1436_s26   ;;  %s1436_s26 = sphi %s1496_s26, %s27_s26   ;;  %s1432_s25 = sphi %s1494_s25, %s1862_s25   ;;  %s1428_s24 = sphi %s1492_s24, %s1861_s24   ;;  %s1424_s23 = sphi %s1490_s23, %s1860_s23   ;;  %s1420_s22 = sphi %s1488_s22, %s1859_s22   ;;  %s1416_s21 = sphi %s1486_s21, %s1858_s21  }
   0xc   : > { %p61_p0 = scmp.ne.s32.totalorder %s1420_s22, %s1416_s21  ;;  %p62_p1 = scmp.eq.s32.totalorder %s1517_s27, 0 }
   0xd   : > { %p156_p2 = scmp.eq.s32.totalorder %s1850_s28, 1  ;;  %p1052_p4 = scmp.ge.s32.totalorder %s1436_s26, 1 }
   0xe   : > { %p1527_p3 = por %p62_p1, %p61_p0  ;;  %p219_p6 = scmp.lt.s32.totalorder %s1436_s26, 3 }
   0xf   : > { %p1532_p5 = por %p156_p2, %p61_p0  ;;  %s1854_s1 = sld [smem:[#allocation16_spill]] }
  0x10   : > { %p1540_p7 = pnand %p1052_p4, %p219_p6  ;;  %p1055_p8 = scmp.ge.s32.totalorder %s1436_s26, 2 }
  0x11   : > { %s1438_s11 = smov [#allocation5]   ;;  %s245_s15 = sshll.u32 %s1846_s3, 4  ;;  %s246_s15 = int_to_ptr.hbm [resolvable:$true] %s245_s15 }
  0x12   : > { %p1106_p9 = pneg %p1540_p7  ;;  %s233_s12 = sshll.u32 %s1438_s11, 4  ;;  %s234_s12 = int_to_ptr.vmem [resolvable:$true] %s233_s12 }
  0x13   : > { %s1439_s16 = smov [#allocation7]   ;;  %s1440_s18 = smov 64  }
  0x14   : > { %p1107_p10 = pnand %p1106_p9, %p62_p1  ;;  %s247_s17 = sshll.u32 %s1439_s16, 4  ;;  %s248_s17 = int_to_ptr.vmem [resolvable:$true] %s247_s17 }
  0x15   : > { %s231_s9 = sshll.u32 %s1854_s1, 4  ;;  %s1441_s19 = smov 4   ;;  %s232_s9 = int_to_ptr.hbm [resolvable:$true] %s231_s9 }
  0x16   : > { %1109 = dma.hbm_to_vmem [thread:$0]  (!%p1107_p10), %s232_s9, 16, %s234_s12, [#allocation6]  }
  0x17   : > { %1112 = dma.hbm_to_vmem [thread:$0]  (!%p1107_p10), %s246_s15, 256, %s248_s17, [#allocation6], %s1440_s18, %s1440_s18, %s1441_s19  }
  0x18   : > { %p150_p11 = scmp.eq.s32.totalorder %s1517_s27, 1  ;;  %s39_s20 = sadd.s32 1, %s1432_s25 }
  0x19   : > { %p41_p12 = scmp.ge.s32.totalorder %s39_s20, 2  ;;  %s48_s7 = sadd.s32 1, %s1424_s23 }
  0x1a   : > { %p55_p13 = scmp.ne.s32.totalorder %s1424_s23, %s1420_s22  ;;  %p56_p0 = scmp.eq.s32.totalorder %s1436_s26, 0 }
  0x1b   : > { %s1864_s20 = smov (%p41_p12, %s39_s20), 0  ;;  %p1129_p4 = scmp.lt.s32.totalorder %s1436_s26, 2 }
  0x1c   : > { %p1560_p2 = por %p150_p11, %p55_p13  ;;  %s43_s9 = ssub.s32 %s1432_s25, %s1864_s20 }
  0x1d   : > { %s261_s11 = sand.u32 1, %s1424_s23   ;;  %p46_p6 = scmp.eq.s32.totalorder %s43_s9, 0 }
  0x1e   : > { %p57_p9 = por %p56_p0, %p55_p13  ;;  %s1056_s12 = sshll.u32 %s261_s11, 3 }
  0x1f   : > { %s1057_s13 = sshll.u32 %s1432_s25, 3  ;;  %s265_s19 = scalar_lea.vmem [#allocation2], %s1056_s12 }
  0x20   : > { %s1570_s14 = scalar_select %p46_p6, %s1424_s23, %s48_s7  }
  0x21   : > { %s270_s17 = scalar_lea.hbm %s1843_s0, %s1057_s13  ;;  %s274_s28 = sshll.u32 %s265_s19, 4  ;;  %s275_s28 = int_to_ptr.vmem [resolvable:$true] %s274_s28 }
  0x22   : > { %s272_s18 = sshll.u32 %s270_s17, 4  ;;  %p1114_p10 = pnand %p1129_p4, %p57_p9  ;;  %s273_s18 = int_to_ptr.hbm [resolvable:$true] %s272_s18 }
  0x23   : > { %s262_s1 = scalar_lea.sflag [#allocation3], %s261_s11  ;;  %283 = sbr.rel (%p1540_p7) target bundleno = 634 (0x27a), region = 36 }
  0x24   : > { %1116 = dma.hbm_to_vmem [thread:$0]  (!%p1114_p10), %s273_s18, 128, %s275_s28, %s262_s1  }
  0x25   : > { %s1580_s7 = sand.u32 (!%p1540_p7), 1, %s1420_s22  }
  0x26   : > { %s1059_s9 = sshll.u32 (!%p1540_p7), %s1580_s7, 3  ;;  %s286_s13 = scalar_lea.sflag (!%p1540_p7), [#allocation3], %s1580_s7 }
  0x27   : > { %s289_s15 = scalar_lea.vmem (!%p1540_p7), [#allocation2], %s1059_s9 }
  0x28   : > { %1399 = dma.done.wait (%p1527_p3), %s286_s13, 128  }
  0x29   : > { %1401 = vsyncadd (%p1527_p3), %s286_s13, 4294967168 }
  0x2a   : > { %1403 = dma.done.wait (%p62_p1), [#allocation6], 272  }
  0x2b   : > { %1405 = vsyncadd (%p62_p1), [#allocation6], 4294967024  ;;  %vm343_vm0 = vcmask 261120   ;;  %v340_v0 = vld [vmem:[%s289_s15] sm:$0xff]  ;;  %v1442_v4 = vmov 32.0   ;;  %v1085_v12 = vld [vmem:[#allocation7] sm:$0xff] }
  0x2c   : > { %v344_v1 = vsel %vm343_vm0, %v340_v0, 0.0  ;;  %v355_v2 = vmul.f32 %v340_v0, %v340_v0  ;;  %1196 = vrcp.f32 %v1442_v4  ;;  %v1086_v10 = vld [vmem:[#allocation7 + $0x8] sm:$0xff]  ;;  %v1194_v27 = vld [vmem:[#allocation5] ss:$0 sm:$0xff]  ;;  %s1443_s29 = smov 104   ;;  %s1444_s10 = smov 120  }
  0x2d   : > { %345 = vadd.xlane.f32.xlu0 %v344_v1  ;;  %409 = vmatpush.bf16.msra.mxu0 %v1086_v10  ;;  %v1195_v30 = vld [vmem:[%s1845_s2] ss:$0 sm:$0xff]  ;;  %s1445_s11 = smov 96   ;;  %s1446_s12 = smov 112   ;;  %v1448_v46 = vmov 1983009808  }
  0x2e   : > { %v356_v3 = vsel %vm343_vm0, %v355_v2, 0.0  ;;  %s1447_s16 = smov 64   ;;  %v439_v47 = vunpack.c.l.s4 %v1448_v46  ;;  %v1449_v1 = vmov 1934713408   ;;  %vm448_vm5 = vcmask 1047556   ;;  %s1664_s17 = sshll.u32 %s1580_s7, 4 }
  0x2f   : > { %v453_v2 = vunpack.c.l.s4 %v1449_v1  ;;  %vm544_vm6 = vcmask 60416   ;;  %s1667_s18 = sshll.u32 %s1428_s24, 4  ;;  %s324_s13 = scalar_lea.vmem [#allocation8], %s1664_s17 }
  0x30   : > { %v1602_v51 = vunpack.c.0.s8 %v439_v47  ;;  %s840_s9 = scalar_lea.hbm %s1847_s4, %s1667_s18  ;;  %s841_s15 = sshll.u32 %s324_s13, 4  ;;  %s1707_s15 = int_to_ptr.vmem [resolvable:$true] %s841_s15 }
  0x31   : > { %410 = vmatpush.bf16.msra.mxu0 %v1085_v12  ;;  %s1691_s1 = sshll.u32 %s840_s9, 4  ;;  %s844_s1 = int_to_ptr.hbm [resolvable:$true] %s1691_s1 }
  0x32   : > { %v1197_v5 = vpop.eup %1196 }
  0x33   : > { %v348_v6 = vmul.f32 32.0, %v1197_v5  ;;  %vm352_vm1 = vweird.f32 %v1197_v5 }
  0x35   : > { %357 = vadd.xlane.f32.xlu0 %v356_v3  ;;  %v349_v7 = vsub.f32 1.0, %v348_v6 }
  0x37   : > { %v350_v8 = vmul.f32 %v1197_v5, %v349_v7 }
  0x39   : > { %v351_v9 = vadd.f32 %v1197_v5, %v350_v8 }
  0x3b   : > { %v353_v13 = vsel %vm352_vm1, %v1197_v5, %v351_v9 }
  0xa0   : > { %v346_v11 = vpop.xlane.xlu0 %345 }
  0xa1   : > { %v354_v14 = vmul.f32 %v353_v13, %v346_v11 }
  0xa3   : > { %v360_v16 = vmul.f32 %v354_v14, %v354_v14  ;;  %v362_v26 = vsub.f32 %v340_v0, %v354_v14 }
  0xa8   : > { %v358_v15 = vpop.xlane.xlu0 %357 }
  0xa9   : > { %v359_v17 = vmul.f32 %v358_v15, %v353_v13 }
  0xab   : > { %v361_v18 = vsub.f32 %v359_v17, %v360_v16  ;;  %v1613_v16 = vunpack.c.0.s8 %v453_v2 }
  0xad   : > { %v363_v19 = vadd.f32 1e-05, %v361_v18 }
  0xaf   : > { %1198 = vrsqrt.f32 %v363_v19  ;;  %vm370_vm3 = vweird.f32 %v363_v19 }
  0xb5   : > { %v1199_v20 = vpop.eup %1198 }
  0xb6   : > { %v365_v21 = vmul.f32 %v1199_v20, %v363_v19  ;;  %vm371_vm2 = vweird.f32 %v1199_v20 }
  0xb7   : > { %vm372_vm4 = vmor %vm370_vm3, %vm371_vm2 }
  0xb8   : > { %v366_v22 = vmul.f32 %v1199_v20, %v365_v21 }
  0xba   : > { %v367_v23 = vmul.f32 0.5, %v366_v22 }
  0xbc   : > { %v368_v24 = vsub.f32 1.5, %v367_v23 }
  0xbe   : > { %v369_v25 = vmul.f32 %v1199_v20, %v368_v24 }
  0xc0   : > { %v373_v28 = vsel %vm372_vm4, %v1199_v20, %v369_v25 }
  0xc1   : > { %v374_v29 = vmul.f32 %v373_v28, %v362_v26 }
  0xc3   : > { %v378_v31 = vmul.f32 %v1194_v27, %v374_v29 }
  0xc5   : > { %v382_v32 = vadd.f32 %v1195_v30, %v378_v31 }
  0xc7   : > { %v383_v33 = vpack.c.bf16 %v382_v32, %v382_v32 }
  0xc9   : > { %1073 = vmatmul.msk.bf16.vlgmr.msra.gmra.mxu0 %vm343_vm0, %v383_v33 }
 0x146   : > { %v412_v34 = vpop.f32.mrf.mxu0 }
 0x147   : > { %v549_v35 = vpack.c.bf16 %v412_v34, %v412_v34  ;;  %v416_v37 = vmul.f32 0.35355338, %v412_v34 }
 0x149   : > { %555 = vrot.lane.b32.xlu2 %v549_v35, %s1443_s29  ;;  %551 = vrot.lane.b32.xlu1 %v549_v35, %s1444_s10  ;;  %v417_v38 = vpack.c.bf16 %v416_v37, %v416_v37 }
 0x14b   : > { %v428_v49 = vshrl.u32 %v417_v38, 16 }
 0x14e   : > { %v414_v36 = vpop.f32.mrf.mxu0 }
 0x151   : > { %557 = vrot.lane.b32.xlu2 %v549_v35, %s1445_s11  ;;  %553 = vrot.lane.b32.xlu1 %v549_v35, %s1446_s12 }
 0x159   : > { %687 = vrot.lane.b32.xlu2 %v549_v35, %s1447_s16  ;;  %419 = vrot.lane.b32.xlu1 %v417_v38, %s1444_s10  ;;  %s858_s10 = scalar_lea.hbm %s1848_s5, %s1667_s18 }
 0x161   : > { %421 = vrot.lane.b32.xlu2 %v417_v38, %s1446_s12  ;;  %s1304_s12 = sshra.s32 %s844_s1, 4  ;;  %s1305_s12 = int_to_ptr.hbm [resolvable:$true] %s1304_s12 }
 0x162   : > { %s1306_s24 = scalar_lea.hbm %s1305_s12, 16  ;;  %p1311_p11 = scmp.lt.s32.totalorder %s1305_s12, %s1847_s4 }
 0x163   : > { %p1307_p1 = scmp.ne.s32.totalorder %s1305_s12, %s1306_s24 }
 0x165   : > { %p1308_p3 = pnand %p1307_p1, %p1560_p2 }
 0x167   : > { %p1309_p7 = pneg %p1308_p3 }
 0x1a3   : > { %v556_v41 = vpop.permute.xlu2 %555 }
 0x1ab   : > { %v558_v42 = vpop.permute.xlu2 %557 }
 0x1ac   : > { %v568_v57 = vshrl.u32 %v558_v42, 16 }
 0x1b3   : > { %v688_v43 = vpop.permute.xlu2 %687 }
 0x1b4   : > { %v698_v0 = vshrl.u32 %v688_v43, 16 }
 0x1bb   : > { %v552_v39 = vpop.permute.xlu1 %551  ;;  %v422_v44 = vpop.permute.xlu2 %421 }
 0x1bc   : > { %559 = vrot.lane.b32.xlu0 %v552_v39, %s1445_s11  ;;  %689 = vrot.lane.b32.xlu1 %v552_v39, %s1447_s16  ;;  %v434_v3 = vshrl.u32 %v422_v44, 16 }
 0x1c3   : > { %v554_v40 = vpop.permute.xlu1 %553 }
 0x1c4   : > { %423 = vrot.lane.b32.xlu0 %v417_v38, %s1443_s29  ;;  %561 = vrot.lane.b32.xlu2 %v554_v40, %s1445_s11 }
 0x1c5   : > { %563 = vrot.lane.b32.xlu1 %v556_v41, %s1445_s11  ;;  %s818_s11 = scalar_lea.sflag [#allocation4], %s1580_s7 }
 0x1cb   : > { %v420_v45 = vpop.permute.xlu1 %419 }
 0x1cc   : > { %693 = vrot.lane.b32.xlu2 %v556_v41, %s1447_s16  ;;  %v429_v48 = vshrl.u32 %v420_v45, 16  ;;  %v427_v52 = vpack.i.b16 %v420_v45, %v417_v38 }
 0x1cd   : > { %691 = vrot.lane.b32.xlu1 %v554_v40, %s1447_s16 }
 0x1ce   : > { %v430_v53 = vpack.i.b16 %v429_v48, %v428_v49  ;;  %v441_v59 = vperm.slane %v427_v52, %v1602_v51 }
 0x1d0   : > { %v468_v60 = vperm.slane %v430_v53, %v1602_v51  ;;  %v450_v5 = vrot.slane %v441_v59, 4 }
 0x1d2   : > { %v476_v6 = vrot.slane %v468_v60, 4 }
 0x21e   : > { %v562_v50 = vpop.permute.xlu2 %561 }
 0x21f   : > { %v574_v15 = vshrl.u32 %v562_v50, 16 }
 0x226   : > { %v1607_v7 = vpop.permute.xlu2 %693 }
 0x227   : > { %v705_v19 = vshrl.u32 %v1607_v7, 16 }
 0x22e   : > { %v560_v54 = vpop.permute.xlu0 %559  ;;  %v690_v55 = vpop.permute.xlu1 %689 }
 0x22f   : > { %v569_v56 = vshrl.u32 %v560_v54, 16  ;;  %v567_v58 = vpack.i.b16 %v560_v54, %v558_v42  ;;  %v697_v61 = vpack.i.b16 %v690_v55, %v688_v43  ;;  %v699_v62 = vshrl.u32 %v690_v55, 16 }
 0x231   : > { %v570_v63 = vpack.i.b16 %v569_v56, %v568_v57  ;;  %v581_v4 = vperm.slane %v567_v58, %v1602_v51  ;;  %v700_v8 = vpack.i.b16 %v699_v62, %v698_v0  ;;  %v1610_v9 = vperm.slane %v697_v61, %v1602_v51 }
 0x233   : > { %v607_v11 = vperm.slane %v570_v63, %v1602_v51  ;;  %v589_v20 = vrot.slane %v581_v4, 4  ;;  %v719_v23 = vrot.slane %v1610_v9, 4  ;;  %v1619_v24 = vperm.slane %v700_v8, %v1602_v51 }
 0x235   : > { %v615_v27 = vrot.slane %v607_v11, 4  ;;  %v745_v52 = vrot.slane %v1619_v24, 4 }
 0x236   : > { %v424_v10 = vpop.permute.xlu0 %423 }
 0x237   : > { %v433_v12 = vpack.i.b16 %v424_v10, %v422_v44  ;;  %v435_v13 = vshrl.u32 %v424_v10, 16  ;;  %v564_v14 = vpop.permute.xlu1 %563 }
 0x238   : > { %v573_v17 = vpack.i.b16 %v564_v14, %v562_v50  ;;  %v575_v18 = vshrl.u32 %v564_v14, 16 }
 0x239   : > { %v436_v21 = vpack.i.b16 %v435_v13, %v434_v3  ;;  %v446_v22 = vperm.slane %v433_v12, %v1602_v51 }
 0x23a   : > { %v576_v25 = vpack.i.b16 %v575_v18, %v574_v15  ;;  %v586_v26 = vperm.slane %v573_v17, %v1602_v51 }
 0x23b   : > { %v447_v28 = vrot.slane %v446_v22, 4  ;;  %v451_v29 = vsel %vm448_vm5, %v446_v22, %v450_v5  ;;  %v473_v30 = vperm.slane %v436_v21, %v1602_v51 }
 0x23c   : > { %v459_v31 = vperm.slane %v451_v29, %v1613_v16  ;;  %v587_v32 = vrot.slane %v586_v26, 4  ;;  %v590_v33 = vsel %vm448_vm5, %v586_v26, %v589_v20  ;;  %v612_v34 = vperm.slane %v576_v25, %v1602_v51 }
 0x23d   : > { %v449_v35 = vsel %vm448_vm5, %v447_v28, %v441_v59  ;;  %v474_v36 = vrot.slane %v473_v30, 4  ;;  %v477_v37 = vsel %vm448_vm5, %v473_v30, %v476_v6  ;;  %v598_v38 = vperm.slane %v590_v33, %v1613_v16 }
 0x23e   : > { %v455_v39 = vperm.slane %v449_v35, %v1613_v16  ;;  %v462_v40 = vrot.slane %v459_v31, 4  ;;  %v485_v41 = vperm.slane %v477_v37, %v1613_v16  ;;  %v588_v42 = vsel %vm448_vm5, %v587_v32, %v581_v4 }
 0x23f   : > { %v475_v43 = vsel %vm448_vm5, %v474_v36, %v468_v60  ;;  %v594_v44 = vperm.slane %v588_v42, %v1613_v16  ;;  %v601_v45 = vrot.slane %v598_v38, 4  ;;  %v613_v46 = vrot.slane %v612_v34, 4  ;;  %v692_v4 = vpop.permute.xlu1 %691 }
 0x240   : > { %v460_v47 = vrot.slane %v455_v39, 4  ;;  %v463_v48 = vsel %vm448_vm5, 0, %v462_v40  ;;  %v481_v49 = vperm.slane %v475_v43, %v1613_v16  ;;  %v488_v50 = vrot.slane %v485_v41, 4 }
 0x241   : > { %v490_v53 = vsel %vm448_vm5, %v462_v40, %v455_v39  ;;  %v495_v54 = vrot.slane %v463_v48, 4  ;;  %v599_v55 = vrot.slane %v594_v44, 4  ;;  %v602_v59 = vsel %vm448_vm5, 0, %v601_v45 }
 0x242   : > { %v461_v56 = vsel %vm448_vm5, 0, %v460_v47  ;;  %v486_v57 = vrot.slane %v481_v49, 4  ;;  %v489_v58 = vsel %vm448_vm5, 0, %v488_v50  ;;  %v494_v60 = vperm.slane %v490_v53, %v1602_v51 }
 0x243   : > { %v496_v61 = vsel %vm448_vm5, %v495_v54, %v461_v56  ;;  %v509_v62 = vsel %vm448_vm5, %v488_v50, %v481_v49  ;;  %v514_v63 = vrot.slane %v489_v58, 4  ;;  %v600_v2 = vsel %vm448_vm5, 0, %v599_v55 }
 0x244   : > { %v487_v0 = vsel %vm448_vm5, 0, %v486_v57  ;;  %v500_v1 = vperm.slane %v496_v61, %v1602_v51  ;;  %v614_v3 = vsel %vm448_vm5, %v613_v46, %v607_v11  ;;  %v616_v6 = vsel %vm448_vm5, %v612_v34, %v615_v27 }
 0x245   : > { %v515_v5 = vsel %vm448_vm5, %v514_v63, %v487_v0  ;;  %v620_v8 = vperm.slane %v614_v3, %v1613_v16  ;;  %v629_v10 = vsel %vm448_vm5, %v601_v45, %v594_v44  ;;  %v513_v13 = vperm.slane %v509_v62, %v1602_v51 }
 0x246   : > { %v501_v12 = vrot.slane %v500_v1, 4  ;;  %v519_v14 = vperm.slane %v515_v5, %v1602_v51  ;;  %v624_v15 = vperm.slane %v616_v6, %v1613_v16  ;;  %v633_v11 = vperm.slane %v629_v10, %v1602_v51 }
 0x247   : > { %v625_v17 = vrot.slane %v620_v8, 4  ;;  %v634_v18 = vrot.slane %v602_v59, 4  ;;  %v704_v20 = vshrl.u32 %v692_v4, 16  ;;  %v703_v26 = vpack.i.b16 %v1607_v7, %v692_v4 }
 0x248   : > { %v502_v21 = vsel %vm448_vm5, %v501_v12, %v494_v60  ;;  %v520_v22 = vrot.slane %v519_v14, 4  ;;  %v627_v25 = vrot.slane %v624_v15, 4 }
 0x249   : > { %v506_v27 = vperm.slane %v502_v21, %v1613_v16  ;;  %v635_v28 = vsel %vm448_vm5, %v634_v18, %v600_v2  ;;  %v706_v29 = vpack.i.b16 %v705_v19, %v704_v20  ;;  %v626_v31 = vsel %vm448_vm5, 0, %v625_v17 }
 0x24a   : > { %v521_v30 = vsel %vm448_vm5, %v520_v22, %v513_v13  ;;  %v628_v32 = vsel %vm448_vm5, 0, %v627_v25  ;;  %v639_v33 = vperm.slane %v635_v28, %v1602_v51  ;;  %v648_v7 = vsel %vm448_vm5, %v627_v25, %v620_v8 }
 0x24b   : > { %v507_v34 = vrot.slane %v506_v27, 4  ;;  %v525_v35 = vperm.slane %v521_v30, %v1613_v16  ;;  %v532_v36 = vshrl.u32 %v506_v27, 16  ;;  %v653_v37 = vrot.slane %v628_v32, 4 }
 0x24c   : > { %v640_v19 = vrot.slane %v639_v33, 4  ;;  %v716_v38 = vperm.slane %v703_v26, %v1602_v51  ;;  %v742_v39 = vperm.slane %v706_v29, %v1602_v51  ;;  %v652_v59 = vperm.slane %v648_v7, %v1602_v51 }
 0x24d   : > { %v508_v40 = vsel %vm448_vm5, 0, %v507_v34  ;;  %v526_v41 = vrot.slane %v525_v35, 4  ;;  %v530_v42 = vpack.i.b16 %v525_v35, %v506_v27  ;;  %v533_v43 = vshrl.u32 %v525_v35, 16 }
 0x24e   : > { %v540_v44 = vshrl.u32 %v508_v40, 16  ;;  %v641_v45 = vsel %vm448_vm5, %v640_v19, %v633_v11  ;;  %v654_v46 = vsel %vm448_vm5, %v653_v37, %v626_v31  ;;  %v717_v47 = vrot.slane %v716_v38, 4 }
 0x24f   : > { %v527_v48 = vsel %vm448_vm5, 0, %v526_v41  ;;  %v534_v49 = vpack.i.b16 %v533_v43, %v532_v36  ;;  %v1686_v50 = vperm.slane %v641_v45, %v1613_v16  ;;  %v658_v53 = vperm.slane %v654_v46, %v1602_v51  ;;  %545 = vst.msk [vmem:[%s324_s13] sm:$0xf] %vm544_vm6, %v530_v42 }
 0x250   : > { %v538_v54 = vpack.i.b16 %v527_v48, %v508_v40  ;;  %v541_v55 = vshrl.u32 %v527_v48, 16  ;;  %v718_v56 = vsel %vm448_vm5, %v717_v47, %v1610_v9  ;;  %v720_v57 = vsel %vm448_vm5, %v716_v38, %v719_v23 }
 0x251   : > { %v646_v58 = vrot.slane %v1686_v50, 4  ;;  %v659_v60 = vrot.slane %v658_v53, 4  ;;  %v724_v61 = vperm.slane %v718_v56, %v1613_v16  ;;  %546 = vst.msk [vmem:[%s324_s13 + $0x4] sm:$0xf] %vm544_vm6, %v534_v49  ;;  %v728_v63 = vperm.slane %v720_v57, %v1613_v16 }
 0x252   : > { %v542_v62 = vpack.i.b16 %v541_v55, %v540_v44  ;;  %v743_v0 = vrot.slane %v742_v39, 4  ;;  %v746_v9 = vsel %vm448_vm5, %v742_v39, %v745_v52  ;;  %547 = vst.msk [vmem:[%s324_s13 + $0x8] sm:$0xf] %vm544_vm6, %v538_v54  ;;  %v671_v4 = vshrl.u32 %v1686_v50, 16 }
 0x253   : > { %v660_v23 = vsel %vm448_vm5, %v659_v60, %v652_v59  ;;  %v729_v1 = vrot.slane %v724_v61, 4  ;;  %v754_v2 = vperm.slane %v746_v9, %v1613_v16  ;;  %v731_v5 = vrot.slane %v728_v63, 4 }
 0x254   : > { %v664_v3 = vperm.slane %v660_v23, %v1613_v16  ;;  %v744_v52 = vsel %vm448_vm5, %v743_v0, %v1619_v24  ;;  %548 = vst.msk [vmem:[%s324_s13 + $0xc] sm:$0xf] %vm544_vm6, %v542_v62  ;;  %v647_v6 = vsel %vm448_vm5, 0, %v646_v58  ;;  %s1310_s13 = scalar_lea.hbm %s1847_s4, 32 }
 0x255   : > { %v730_v8 = vsel %vm448_vm5, 0, %v729_v1  ;;  %v750_v10 = vperm.slane %v744_v52, %v1613_v16  ;;  %v757_v12 = vrot.slane %v754_v2, 4  ;;  %p1312_p12 = scmp.lt.s32.totalorder %s1310_s13, %s1306_s24 }
 0x257   : > { %p1313_p13 = por %p1312_p12, %p1311_p11 }
 0x259   : > { %p1314_p0 = pnand %p1313_p13, %p1309_p7 }
 0x25b   : > { %1317 = shalt.err (!%p1314_p0)
}
 0x25c   : > { %s1450_s7 = smov 4   ;;  %v665_v24 = vrot.slane %v664_v3, 4  ;;  %v669_v13 = vpack.i.b16 %v664_v3, %v1686_v50  ;;  %v672_v14 = vshrl.u32 %v664_v3, 16  ;;  %v732_v15 = vsel %vm448_vm5, 0, %v731_v5  ;;  %s822_s12 = sand.u32 1, %s1517_s27  }
 0x25d   : > { %1100 = dma.vmem_to_hbm [thread:$0]  (%p1560_p2), %s1707_s15, 256, %s844_s1, %s818_s11, %s1447_s16, %s1447_s16, %s1450_s7   ;;  %v755_v17 = vrot.slane %v750_v10, 4  ;;  %v758_v11 = vsel %vm448_vm5, 0, %v757_v12  ;;  %v764_v18 = vrot.slane %v732_v15, 4  ;;  %v679_v22 = vshrl.u32 %v647_v6, 16 }
 0x25e   : > { %v666_v20 = vsel %vm448_vm5, 0, %v665_v24  ;;  %v673_v21 = vpack.i.b16 %v672_v14, %v671_v4  ;;  %v759_v25 = vsel %vm448_vm5, %v731_v5, %v724_v61  ;;  %s331_s24 = scalar_lea.vmem [#allocation9], %s1664_s17  ;;  %s1756_s19 = sshll.u32 %s858_s10, 4  ;;  %v783_v31 = vrot.slane %v758_v11, 4  ;;  %s862_s19 = int_to_ptr.hbm [resolvable:$true] %s1756_s19 }
 0x25f   : > { %683 = vst.msk [vmem:[%s331_s24] sm:$0xf] %vm544_vm6, %v669_v13  ;;  %s859_s15 = sshll.u32 %s331_s24, 4  ;;  %v677_v26 = vpack.i.b16 %v666_v20, %v647_v6  ;;  %v680_v27 = vshrl.u32 %v666_v20, 16  ;;  %v756_v28 = vsel %vm448_vm5, 0, %v755_v17  ;;  %v765_v29 = vsel %vm448_vm5, %v764_v18, %v730_v8  ;;  %s1770_s27 = scalar_lea.sflag [#allocation10], %s822_s12  ;;  %s860_s15 = int_to_ptr.vmem [resolvable:$true] %s859_s15 }
 0x260   : > { %v769_v30 = vperm.slane %v765_v29, %v1602_v51  ;;  %684 = vst.msk [vmem:[%s331_s24 + $0x4] sm:$0xf] %vm544_vm6, %v673_v21  ;;  %v763_v33 = vperm.slane %v759_v25, %v1602_v51  ;;  %v778_v35 = vsel %vm448_vm5, %v757_v12, %v750_v10  ;;  %v784_v36 = vsel %vm448_vm5, %v783_v31, %v756_v28  ;;  %s1332_s10 = sshra.s32 %s862_s19, 4  ;;  %s1338_s29 = scalar_lea.hbm %s1848_s5, 32  ;;  %s1333_s10 = int_to_ptr.hbm [resolvable:$true] %s1332_s10 }
 0x261   : > { %v681_v32 = vpack.i.b16 %v680_v27, %v679_v22  ;;  %685 = vst.msk [vmem:[%s331_s24 + $0x8] sm:$0xf] %vm544_vm6, %v677_v26  ;;  %v788_v7 = vperm.slane %v784_v36, %v1602_v51  ;;  %s1334_s9 = scalar_lea.hbm %s1333_s10, 16  ;;  %p1339_p10 = scmp.lt.s32.totalorder %s1333_s10, %s1848_s5 }
 0x262   : > { %v770_v34 = vrot.slane %v769_v30, 4  ;;  %p1335_p4 = scmp.ne.s32.totalorder %s1333_s10, %s1334_s9  ;;  %p1340_p1 = scmp.lt.s32.totalorder %s1338_s29, %s1334_s9 }
 0x263   : > { %686 = vst.msk [vmem:[%s331_s24 + $0xc] sm:$0xf] %vm544_vm6, %v681_v32 }
 0x264   : > { %v771_v19 = vsel %vm448_vm5, %v770_v34, %v763_v33  ;;  %p1336_p6 = pnand %p1335_p4, %p1560_p2  ;;  %p1341_p3 = por %p1340_p1, %p1339_p10 }
 0x266   : > { %p1337_p9 = pneg %p1336_p6 }
 0x268   : > { %p1342_p7 = pnand %p1341_p3, %p1337_p9 }
 0x26a   : > { %1345 = shalt.err (!%p1342_p7)
}
 0x26b   : > { %1101 = dma.vmem_to_hbm [thread:$0]  (%p1560_p2), %s860_s15, 256, %s862_s19, %s1770_s27, %s1447_s16, %s1447_s16, %s1450_s7   ;;  %v775_v37 = vperm.slane %v771_v19, %v1613_v16  ;;  %v782_v38 = vperm.slane %v778_v35, %v1602_v51  ;;  %v789_v39 = vrot.slane %v788_v7, 4 }
 0x26c   : > { %s876_s10 = scalar_lea.hbm %s1849_s6, %s1667_s18  ;;  %s338_s19 = scalar_lea.vmem [#allocation11], %s1664_s17 }
 0x26d   : > { %v776_v40 = vrot.slane %v775_v37, 4  ;;  %v790_v41 = vsel %vm448_vm5, %v789_v39, %v782_v38  ;;  %v801_v43 = vshrl.u32 %v775_v37, 16  ;;  %s1796_s15 = sshll.u32 %s876_s10, 4  ;;  %s877_s9 = sshll.u32 %s338_s19, 4  ;;  %s878_s9 = int_to_ptr.vmem [resolvable:$true] %s877_s9  ;;  %s880_s15 = int_to_ptr.hbm [resolvable:$true] %s1796_s15 }
 0x26e   : > { %v794_v42 = vperm.slane %v790_v41, %v1613_v16  ;;  %s1360_s18 = sshra.s32 %s880_s15, 4  ;;  %s1366_s29 = scalar_lea.hbm %s1849_s6, 32  ;;  %s1361_s18 = int_to_ptr.hbm [resolvable:$true] %s1360_s18 }
 0x26f   : > { %v777_v44 = vsel %vm448_vm5, 0, %v776_v40  ;;  %s1362_s13 = scalar_lea.hbm %s1361_s18, 16  ;;  %p1367_p0 = scmp.lt.s32.totalorder %s1361_s18, %s1849_s6 }
 0x270   : > { %v795_v45 = vrot.slane %v794_v42, 4  ;;  %v799_v46 = vpack.i.b16 %v794_v42, %v775_v37  ;;  %v802_v47 = vshrl.u32 %v794_v42, 16  ;;  %v809_v16 = vshrl.u32 %v777_v44, 16  ;;  %p1363_p11 = scmp.ne.s32.totalorder %s1361_s18, %s1362_s13  ;;  %p1368_p4 = scmp.lt.s32.totalorder %s1366_s29, %s1362_s13 }
 0x272   : > { %v796_v48 = vsel %vm448_vm5, 0, %v795_v45  ;;  %v803_v49 = vpack.i.b16 %v802_v47, %v801_v43  ;;  %813 = vst.msk [vmem:[%s338_s19] sm:$0xf] %vm544_vm6, %v799_v46  ;;  %p1364_p12 = pnand %p1363_p11, %p1560_p2  ;;  %p1369_p6 = por %p1368_p4, %p1367_p0 }
 0x273   : > { %v807_v51 = vpack.i.b16 %v796_v48, %v777_v44  ;;  %v810_v50 = vshrl.u32 %v796_v48, 16 }
 0x274   : > { %814 = vst.msk [vmem:[%s338_s19 + $0x4] sm:$0xf] %vm544_vm6, %v803_v49  ;;  %p1365_p13 = pneg %p1364_p12 }
 0x275   : > { %v811_v53 = vpack.i.b16 %v810_v50, %v809_v16  ;;  %815 = vst.msk [vmem:[%s338_s19 + $0x8] sm:$0xf] %vm544_vm6, %v807_v51 }
 0x276   : > { %p1370_p9 = pnand %p1369_p6, %p1365_p13 }
 0x277   : > { %816 = vst.msk [vmem:[%s338_s19 + $0xc] sm:$0xf] %vm544_vm6, %v811_v53 }
 0x278   : > { %1373 = shalt.err (!%p1370_p9)
}
 0x279   : > { %1102 = dma.vmem_to_hbm [thread:$0]  (%p1560_p2), %s878_s9, 256, %s880_s15, %s1770_s27, %s1447_s16, %s1447_s16, %s1450_s7  }
 0x27a PF: > { %s894_s12 = sand.u32 1, %s1416_s21   ;;  %p1118_p10 = pnand %p1055_p8, %p1532_p5 }
 0x27b   : > { %s895_s24 = scalar_lea.sflag [#allocation4], %s894_s12 }
 0x27c   : > { %p1119_p1 = pneg %p1118_p10 }
 0x27e   : > { %1407 = dma.done.wait (%p1119_p1), %s895_s24, 256  }
 0x27f   : > { %1409 = vsyncadd (%p1119_p1), %s895_s24, 4294967040  ;;  %s1857_s10 = sadd.s32 4294967294, %s1436_s26  }
 0x280   : > { %s904_s8 = sand.u32 1, %s1857_s10  }
 0x281   : > { %s905_s19 = scalar_lea.sflag [#allocation10], %s904_s8 }
 0x282   : > { %1411 = dma.done.wait (%p1119_p1), %s905_s19, 512  }
 0x283   : > { %1413 = vsyncadd (%p1119_p1), %s905_s19, 4294966784  ;;  %s27_s26 = sadd.s32 1, %s1436_s26   ;;  %s1858_s21 = smov %s1420_s22 }
 0x284   : > { %p24_p2 = scmp.ge.s32.totalorder %s27_s26, 4   ;;  %s1859_s22 = smov %s1424_s23 }
 0x285   : > { %s1860_s23 = smov %s1570_s14  ;;  %s1861_s24 = smov %s1432_s25 }
 0x286   : > { %s1862_s25 = smov %s1864_s20  ;;  %26 = sbr.rel (!%p24_p2) target bundleno = 11 (0xb), region = 121 }
 0x28b   :  { %921 = vsyncpa [#allocation3], 1 }
 0x28c   :  { %923 = vsyncpa [#allocation3 + $0x1], 1 }
 0x28d   :  { %924 = vsyncpa [#allocation6], 1 }
 0x28e   :  { %925 = vsyncpa [#allocation4], 1 }
 0x28f   :  { %927 = vsyncpa [#allocation4 + $0x1], 1 }
 0x290   :  { %928 = vsyncpa [#allocation10], 1 }
 0x291   :  { %930 = vsyncpa [#allocation10 + $0x1], 1 }

// kernel: tpu_custom_call.1
= control target key start
LH: loop header
LB: loop body
LE: loop exit
PB: predicated region body
PF: predicated region fallthrough
CT: control target
= control target key end

     0   :  { %s1843_s0 = inlined_call_operand.hbm [shape: f32[2,8,32], index: 0, kind: input, shape index: {}]   ;;  %s1844_s1 = inlined_call_operand.hbm [shape: f32[1,32], index: 1, kind: input, shape index: {}]   ;;  %s1845_s2 = inlined_call_operand.vmem [shape: f32[1,32], index: 2, kind: input, shape index: {}]   ;;  %s1846_s3 = inlined_call_operand.hbm [shape: bf16[32,96], index: 3, kind: input, shape index: {}]   ;;  %s1847_s4 = inlined_call_operand.hbm [shape: bf16[2,4,8,8], index: 4, kind: output, shape index: {0}]   ;;  %s1848_s5 = inlined_call_operand.hbm [shape: bf16[2,4,8,8], index: 5, kind: output, shape index: {1}]   ;;  %s1849_s6 = inlined_call_operand.hbm [shape: bf16[2,4,8,8], index: 6, kind: output, shape index: {2}]  }
   0x1   :  { %1851 = sst [smem:[#allocation16_spill]] %s1844_s1 }
   0x2   :  { %12 = vsyncpa [#allocation3], 0 }
   0x3   :  { %14 = vsyncpa [#allocation3 + $0x1], 0 }
   0x4   :  { %15 = vsyncpa [#allocation6], 0 }
   0x5   :  { %16 = vsyncpa [#allocation4], 0 }
   0x6   :  { %18 = vsyncpa [#allocation4 + $0x1], 0 }
   0x7   :  { %19 = vsyncpa [#allocation10], 0 }
   0x8   :  { %21 = vsyncpa [#allocation10 + $0x1], 0  ;;  %s1486_s21 = smov 0   ;;  %s1488_s22 = smov 0  }
   0x9   :  { %s1490_s23 = smov 0   ;;  %s1492_s24 = smov 0  }
   0xa   :  { %s1494_s25 = smov 0   ;;  %s1496_s26 = smov 0  }
   0xb LB: > { %s1517_s27 = sadd.s32 4294967295, %s1436_s26   ;;  %s1850_s28 = sadd.s32 4294967294, %s1436_s26   ;;  %s1436_s26 = sphi %s1496_s26, %s27_s26   ;;  %s1432_s25 = sphi %s1494_s25, %s1862_s25   ;;  %s1428_s24 = sphi %s1492_s24, %s1861_s24   ;;  %s1424_s23 = sphi %s1490_s23, %s1860_s23   ;;  %s1420_s22 = sphi %s1488_s22, %s1859_s22   ;;  %s1416_s21 = sphi %s1486_s21, %s1858_s21  }
   0xc   : > { %p61_p0 = scmp.ne.s32.totalorder %s1420_s22, %s1416_s21  ;;  %p62_p1 = scmp.eq.s32.totalorder %s1517_s27, 0 }
   0xd   : > { %p156_p2 = scmp.eq.s32.totalorder %s1850_s28, 1  ;;  %p1052_p4 = scmp.ge.s32.totalorder %s1436_s26, 1 }
   0xe   : > { %p1527_p3 = por %p62_p1, %p61_p0  ;;  %p219_p6 = scmp.lt.s32.totalorder %s1436_s26, 3 }
   0xf   : > { %p1532_p5 = por %p156_p2, %p61_p0  ;;  %s1854_s1 = sld [smem:[#allocation16_spill]] }
  0x10   : > { %p1540_p7 = pnand %p1052_p4, %p219_p6  ;;  %p1055_p8 = scmp.ge.s32.totalorder %s1436_s26, 2 }
  0x11   : > { %s1438_s11 = smov [#allocation5]   ;;  %s245_s15 = sshll.u32 %s1846_s3, 4  ;;  %s246_s15 = int_to_ptr.hbm [resolvable:$true] %s245_s15 }
  0x12   : > { %p1106_p9 = pneg %p1540_p7  ;;  %s233_s12 = sshll.u32 %s1438_s11, 4  ;;  %s234_s12 = int_to_ptr.vmem [resolvable:$true] %s233_s12 }
  0x13   : > { %s1439_s16 = smov [#allocation7]   ;;  %s1440_s18 = smov 64  }
  0x14   : > { %p1107_p10 = pnand %p1106_p9, %p62_p1  ;;  %s247_s17 = sshll.u32 %s1439_s16, 4  ;;  %s248_s17 = int_to_ptr.vmem [resolvable:$true] %s247_s17 }
  0x15   : > { %s231_s9 = sshll.u32 %s1854_s1, 4  ;;  %s1441_s19 = smov 4   ;;  %s232_s9 = int_to_ptr.hbm [resolvable:$true] %s231_s9 }
  0x16   : > { %1109 = dma.hbm_to_vmem [thread:$0]  (!%p1107_p10), %s232_s9, 16, %s234_s12, [#allocation6]  }
  0x17   : > { %1112 = dma.hbm_to_vmem [thread:$0]  (!%p1107_p10), %s246_s15, 256, %s248_s17, [#allocation6], %s1440_s18, %s1440_s18, %s1441_s19  }
  0x18   : > { %p150_p11 = scmp.eq.s32.totalorder %s1517_s27, 1  ;;  %s39_s20 = sadd.s32 1, %s1432_s25 }
  0x19   : > { %p41_p12 = scmp.ge.s32.totalorder %s39_s20, 2  ;;  %s48_s7 = sadd.s32 1, %s1424_s23 }
  0x1a   : > { %p55_p13 = scmp.ne.s32.totalorder %s1424_s23, %s1420_s22  ;;  %p56_p0 = scmp.eq.s32.totalorder %s1436_s26, 0 }
  0x1b   : > { %s1864_s20 = smov (%p41_p12, %s39_s20), 0  ;;  %p1129_p4 = scmp.lt.s32.totalorder %s1436_s26, 2 }
  0x1c   : > { %p1560_p2 = por %p150_p11, %p55_p13  ;;  %s43_s9 = ssub.s32 %s1432_s25, %s1864_s20 }
  0x1d   : > { %s261_s11 = sand.u32 1, %s1424_s23   ;;  %p46_p6 = scmp.eq.s32.totalorder %s43_s9, 0 }
  0x1e   : > { %p57_p9 = por %p56_p0, %p55_p13  ;;  %s1056_s12 = sshll.u32 %s261_s11, 3 }
  0x1f   : > { %s1057_s13 = sshll.u32 %s1432_s25, 3  ;;  %s265_s19 = scalar_lea.vmem [#allocation2], %s1056_s12 }
  0x20   : > { %s1570_s14 = scalar_select %p46_p6, %s1424_s23, %s48_s7  }
  0x21   : > { %s270_s17 = scalar_lea.hbm %s1843_s0, %s1057_s13  ;;  %s274_s28 = sshll.u32 %s265_s19, 4  ;;  %s275_s28 = int_to_ptr.vmem [resolvable:$true] %s274_s28 }
  0x22   : > { %s272_s18 = sshll.u32 %s270_s17, 4  ;;  %p1114_p10 = pnand %p1129_p4, %p57_p9  ;;  %s273_s18 = int_to_ptr.hbm [resolvable:$true] %s272_s18 }
  0x23   : > { %s262_s1 = scalar_lea.sflag [#allocation3], %s261_s11  ;;  %283 = sbr.rel (%p1540_p7) target bundleno = 634 (0x27a), region = 36 }
  0x24   : > { %1116 = dma.hbm_to_vmem [thread:$0]  (!%p1114_p10), %s273_s18, 128, %s275_s28, %s262_s1  }
  0x25   : > { %s1580_s7 = sand.u32 (!%p1540_p7), 1, %s1420_s22  }
  0x26   : > { %s1059_s9 = sshll.u32 (!%p1540_p7), %s1580_s7, 3  ;;  %s286_s13 = scalar_lea.sflag (!%p1540_p7), [#allocation3], %s1580_s7 }
  0x27   : > { %s289_s15 = scalar_lea.vmem (!%p1540_p7), [#allocation2], %s1059_s9 }
  0x28   : > { %1399 = dma.done.wait (%p1527_p3), %s286_s13, 128  }
  0x29   : > { %1401 = vsyncadd (%p1527_p3), %s286_s13, 4294967168 }
  0x2a   : > { %1403 = dma.done.wait (%p62_p1), [#allocation6], 272  }
  0x2b   : > { %1405 = vsyncadd (%p62_p1), [#allocation6], 4294967024  ;;  %vm343_vm0 = vcmask 261120   ;;  %v340_v0 = vld [vmem:[%s289_s15] sm:$0xff]  ;;  %v1442_v4 = vmov 32.0   ;;  %v1085_v12 = vld [vmem:[#allocation7] sm:$0xff] }
  0x2c   : > { %v344_v1 = vsel %vm343_vm0, %v340_v0, 0.0  ;;  %v355_v2 = vmul.f32 %v340_v0, %v340_v0  ;;  %1196 = vrcp.f32 %v1442_v4  ;;  %v1086_v10 = vld [vmem:[#allocation7 + $0x8] sm:$0xff]  ;;  %v1194_v27 = vld [vmem:[#allocation5] ss:$0 sm:$0xff]  ;;  %s1443_s29 = smov 104   ;;  %s1444_s10 = smov 120  }
  0x2d   : > { %345 = vadd.xlane.f32.xlu0 %v344_v1  ;;  %409 = vmatpush.bf16.msra.mxu0 %v1086_v10  ;;  %v1195_v30 = vld [vmem:[%s1845_s2] ss:$0 sm:$0xff]  ;;  %s1445_s11 = smov 96   ;;  %s1446_s12 = smov 112   ;;  %v1448_v46 = vmov 1983009808  }
  0x2e   : > { %v356_v3 = vsel %vm343_vm0, %v355_v2, 0.0  ;;  %s1447_s16 = smov 64   ;;  %v439_v47 = vunpack.c.l.s4 %v1448_v46  ;;  %v1449_v1 = vmov 1934713408   ;;  %vm448_vm5 = vcmask 1047556   ;;  %s1664_s17 = sshll.u32 %s1580_s7, 4 }
  0x2f   : > { %v453_v2 = vunpack.c.l.s4 %v1449_v1  ;;  %vm544_vm6 = vcmask 60416   ;;  %s1667_s18 = sshll.u32 %s1428_s24, 4  ;;  %s324_s13 = scalar_lea.vmem [#allocation8], %s1664_s17 }
  0x30   : > { %v1602_v51 = vunpack.c.0.s8 %v439_v47  ;;  %s840_s9 = scalar_lea.hbm %s1847_s4, %s1667_s18  ;;  %s841_s15 = sshll.u32 %s324_s13, 4  ;;  %s1707_s15 = int_to_ptr.vmem [resolvable:$true] %s841_s15 }
  0x31   : > { %410 = vmatpush.bf16.msra.mxu0 %v1085_v12  ;;  %s1691_s1 = sshll.u32 %s840_s9, 4  ;;  %s844_s1 = int_to_ptr.hbm [resolvable:$true] %s1691_s1 }
  0x32   : > { %v1197_v5 = vpop.eup %1196 }
  0x33   : > { %v348_v6 = vmul.f32 32.0, %v1197_v5  ;;  %vm352_vm1 = vweird.f32 %v1197_v5 }
  0x35   : > { %357 = vadd.xlane.f32.xlu0 %v356_v3  ;;  %v349_v7 = vsub.f32 1.0, %v348_v6 }
  0x37   : > { %v350_v8 = vmul.f32 %v1197_v5, %v349_v7 }
  0x39   : > { %v351_v9 = vadd.f32 %v1197_v5, %v350_v8 }
  0x3b   : > { %v353_v13 = vsel %vm352_vm1, %v1197_v5, %v351_v9 }
  0xa0   : > { %v346_v11 = vpop.xlane.xlu0 %345 }
  0xa1   : > { %v354_v14 = vmul.f32 %v353_v13, %v346_v11 }
  0xa3   : > { %v360_v16 = vmul.f32 %v354_v14, %v354_v14  ;;  %v362_v26 = vsub.f32 %v340_v0, %v354_v14 }
  0xa8   : > { %v358_v15 = vpop.xlane.xlu0 %357 }
  0xa9   : > { %v359_v17 = vmul.f32 %v358_v15, %v353_v13 }
  0xab   : > { %v361_v18 = vsub.f32 %v359_v17, %v360_v16  ;;  %v1613_v16 = vunpack.c.0.s8 %v453_v2 }
  0xad   : > { %v363_v19 = vadd.f32 1e-05, %v361_v18 }
  0xaf   : > { %1198 = vrsqrt.f32 %v363_v19  ;;  %vm370_vm3 = vweird.f32 %v363_v19 }
  0xb5   : > { %v1199_v20 = vpop.eup %1198 }
  0xb6   : > { %v365_v21 = vmul.f32 %v1199_v20, %v363_v19  ;;  %vm371_vm2 = vweird.f32 %v1199_v20 }
  0xb7   : > { %vm372_vm4 = vmor %vm370_vm3, %vm371_vm2 }
  0xb8   : > { %v366_v22 = vmul.f32 %v1199_v20, %v365_v21 }
  0xba   : > { %v367_v23 = vmul.f32 0.5, %v366_v22 }
  0xbc   : > { %v368_v24 = vsub.f32 1.5, %v367_v23 }
  0xbe   : > { %v369_v25 = vmul.f32 %v1199_v20, %v368_v24 }
  0xc0   : > { %v373_v28 = vsel %vm372_vm4, %v1199_v20, %v369_v25 }
  0xc1   : > { %v374_v29 = vmul.f32 %v373_v28, %v362_v26 }
  0xc3   : > { %v378_v31 = vmul.f32 %v1194_v27, %v374_v29 }
  0xc5   : > { %v382_v32 = vadd.f32 %v1195_v30, %v378_v31 }
  0xc7   : > { %v383_v33 = vpack.c.bf16 %v382_v32, %v382_v32 }
  0xc9   : > { %1073 = vmatmul.msk.bf16.vlgmr.msra.gmra.mxu0 %vm343_vm0, %v383_v33 }
 0x146   : > { %v412_v34 = vpop.f32.mrf.mxu0 }
 0x147   : > { %v549_v35 = vpack.c.bf16 %v412_v34, %v412_v34  ;;  %v416_v37 = vmul.f32 0.35355338, %v412_v34 }
 0x149   : > { %555 = vrot.lane.b32.xlu2 %v549_v35, %s1443_s29  ;;  %551 = vrot.lane.b32.xlu1 %v549_v35, %s1444_s10  ;;  %v417_v38 = vpack.c.bf16 %v416_v37, %v416_v37 }
 0x14b   : > { %v428_v49 = vshrl.u32 %v417_v38, 16 }
 0x14e   : > { %v414_v36 = vpop.f32.mrf.mxu0 }
 0x151   : > { %557 = vrot.lane.b32.xlu2 %v549_v35, %s1445_s11  ;;  %553 = vrot.lane.b32.xlu1 %v549_v35, %s1446_s12 }
 0x159   : > { %687 = vrot.lane.b32.xlu2 %v549_v35, %s1447_s16  ;;  %419 = vrot.lane.b32.xlu1 %v417_v38, %s1444_s10  ;;  %s858_s10 = scalar_lea.hbm %s1848_s5, %s1667_s18 }
 0x161   : > { %421 = vrot.lane.b32.xlu2 %v417_v38, %s1446_s12  ;;  %s1304_s12 = sshra.s32 %s844_s1, 4  ;;  %s1305_s12 = int_to_ptr.hbm [resolvable:$true] %s1304_s12 }
 0x162   : > { %s1306_s24 = scalar_lea.hbm %s1305_s12, 16  ;;  %p1311_p11 = scmp.lt.s32.totalorder %s1305_s12, %s1847_s4 }
 0x163   : > { %p1307_p1 = scmp.ne.s32.totalorder %s1305_s12, %s1306_s24 }
 0x165   : > { %p1308_p3 = pnand %p1307_p1, %p1560_p2 }
 0x167   : > { %p1309_p7 = pneg %p1308_p3 }
 0x1a3   : > { %v556_v41 = vpop.permute.xlu2 %555 }
 0x1ab   : > { %v558_v42 = vpop.permute.xlu2 %557 }
 0x1ac   : > { %v568_v57 = vshrl.u32 %v558_v42, 16 }
 0x1b3   : > { %v688_v43 = vpop.permute.xlu2 %687 }
 0x1b4   : > { %v698_v0 = vshrl.u32 %v688_v43, 16 }
 0x1bb   : > { %v552_v39 = vpop.permute.xlu1 %551  ;;  %v422_v44 = vpop.permute.xlu2 %421 }
 0x1bc   : > { %559 = vrot.lane.b32.xlu0 %v552_v39, %s1445_s11  ;;  %689 = vrot.lane.b32.xlu1 %v552_v39, %s1447_s16  ;;  %v434_v3 = vshrl.u32 %v422_v44, 16 }
 0x1c3   : > { %v554_v40 = vpop.permute.xlu1 %553 }
 0x1c4   : > { %423 = vrot.lane.b32.xlu0 %v417_v38, %s1443_s29  ;;  %561 = vrot.lane.b32.xlu2 %v554_v40, %s1445_s11 }
 0x1c5   : > { %563 = vrot.lane.b32.xlu1 %v556_v41, %s1445_s11  ;;  %s818_s11 = scalar_lea.sflag [#allocation4], %s1580_s7 }
 0x1cb   : > { %v420_v45 = vpop.permute.xlu1 %419 }
 0x1cc   : > { %693 = vrot.lane.b32.xlu2 %v556_v41, %s1447_s16  ;;  %v429_v48 = vshrl.u32 %v420_v45, 16  ;;  %v427_v52 = vpack.i.b16 %v420_v45, %v417_v38 }
 0x1cd   : > { %691 = vrot.lane.b32.xlu1 %v554_v40, %s1447_s16 }
 0x1ce   : > { %v430_v53 = vpack.i.b16 %v429_v48, %v428_v49  ;;  %v441_v59 = vperm.slane %v427_v52, %v1602_v51 }
 0x1d0   : > { %v468_v60 = vperm.slane %v430_v53, %v1602_v51  ;;  %v450_v5 = vrot.slane %v441_v59, 4 }
 0x1d2   : > { %v476_v6 = vrot.slane %v468_v60, 4 }
 0x21e   : > { %v562_v50 = vpop.permute.xlu2 %561 }
 0x21f   : > { %v574_v15 = vshrl.u32 %v562_v50, 16 }
 0x226   : > { %v1607_v7 = vpop.permute.xlu2 %693 }
 0x227   : > { %v705_v19 = vshrl.u32 %v1607_v7, 16 }
 0x22e   : > { %v560_v54 = vpop.permute.xlu0 %559  ;;  %v690_v55 = vpop.permute.xlu1 %689 }
 0x22f   : > { %v569_v56 = vshrl.u32 %v560_v54, 16  ;;  %v567_v58 = vpack.i.b16 %v560_v54, %v558_v42  ;;  %v697_v61 = vpack.i.b16 %v690_v55, %v688_v43  ;;  %v699_v62 = vshrl.u32 %v690_v55, 16 }
 0x231   : > { %v570_v63 = vpack.i.b16 %v569_v56, %v568_v57  ;;  %v581_v4 = vperm.slane %v567_v58, %v1602_v51  ;;  %v700_v8 = vpack.i.b16 %v699_v62, %v698_v0  ;;  %v1610_v9 = vperm.slane %v697_v61, %v1602_v51 }
 0x233   : > { %v607_v11 = vperm.slane %v570_v63, %v1602_v51  ;;  %v589_v20 = vrot.slane %v581_v4, 4  ;;  %v719_v23 = vrot.slane %v1610_v9, 4  ;;  %v1619_v24 = vperm.slane %v700_v8, %v1602_v51 }
 0x235   : > { %v615_v27 = vrot.slane %v607_v11, 4  ;;  %v745_v52 = vrot.slane %v1619_v24, 4 }
 0x236   : > { %v424_v10 = vpop.permute.xlu0 %423 }
 0x237   : > { %v433_v12 = vpack.i.b16 %v424_v10, %v422_v44  ;;  %v435_v13 = vshrl.u32 %v424_v10, 16  ;;  %v564_v14 = vpop.permute.xlu1 %563 }
 0x238   : > { %v573_v17 = vpack.i.b16 %v564_v14, %v562_v50  ;;  %v575_v18 = vshrl.u32 %v564_v14, 16 }
 0x239   : > { %v436_v21 = vpack.i.b16 %v435_v13, %v434_v3  ;;  %v446_v22 = vperm.slane %v433_v12, %v1602_v51 }
 0x23a   : > { %v576_v25 = vpack.i.b16 %v575_v18, %v574_v15  ;;  %v586_v26 = vperm.slane %v573_v17, %v1602_v51 }
 0x23b   : > { %v447_v28 = vrot.slane %v446_v22, 4  ;;  %v451_v29 = vsel %vm448_vm5, %v446_v22, %v450_v5  ;;  %v473_v30 = vperm.slane %v436_v21, %v1602_v51 }
 0x23c   : > { %v459_v31 = vperm.slane %v451_v29, %v1613_v16  ;;  %v587_v32 = vrot.slane %v586_v26, 4  ;;  %v590_v33 = vsel %vm448_vm5, %v586_v26, %v589_v20  ;;  %v612_v34 = vperm.slane %v576_v25, %v1602_v51 }
 0x23d   : > { %v449_v35 = vsel %vm448_vm5, %v447_v28, %v441_v59  ;;  %v474_v36 = vrot.slane %v473_v30, 4  ;;  %v477_v37 = vsel %vm448_vm5, %v473_v30, %v476_v6  ;;  %v598_v38 = vperm.slane %v590_v33, %v1613_v16 }
 0x23e   : > { %v455_v39 = vperm.slane %v449_v35, %v1613_v16  ;;  %v462_v40 = vrot.slane %v459_v31, 4  ;;  %v485_v41 = vperm.slane %v477_v37, %v1613_v16  ;;  %v588_v42 = vsel %vm448_vm5, %v587_v32, %v581_v4 }
 0x23f   : > { %v475_v43 = vsel %vm448_vm5, %v474_v36, %v468_v60  ;;  %v594_v44 = vperm.slane %v588_v42, %v1613_v16  ;;  %v601_v45 = vrot.slane %v598_v38, 4  ;;  %v613_v46 = vrot.slane %v612_v34, 4  ;;  %v692_v4 = vpop.permute.xlu1 %691 }
 0x240   : > { %v460_v47 = vrot.slane %v455_v39, 4  ;;  %v463_v48 = vsel %vm448_vm5, 0, %v462_v40  ;;  %v481_v49 = vperm.slane %v475_v43, %v1613_v16  ;;  %v488_v50 = vrot.slane %v485_v41, 4 }
 0x241   : > { %v490_v53 = vsel %vm448_vm5, %v462_v40, %v455_v39  ;;  %v495_v54 = vrot.slane %v463_v48, 4  ;;  %v599_v55 = vrot.slane %v594_v44, 4  ;;  %v602_v59 = vsel %vm448_vm5, 0, %v601_v45 }
 0x242   : > { %v461_v56 = vsel %vm448_vm5, 0, %v460_v47  ;;  %v486_v57 = vrot.slane %v481_v49, 4  ;;  %v489_v58 = vsel %vm448_vm5, 0, %v488_v50  ;;  %v494_v60 = vperm.slane %v490_v53, %v1602_v51 }
 0x243   : > { %v496_v61 = vsel %vm448_vm5, %v495_v54, %v461_v56  ;;  %v509_v62 = vsel %vm448_vm5, %v488_v50, %v481_v49  ;;  %v514_v63 = vrot.slane %v489_v58, 4  ;;  %v600_v2 = vsel %vm448_vm5, 0, %v599_v55 }
 0x244   : > { %v487_v0 = vsel %vm448_vm5, 0, %v486_v57  ;;  %v500_v1 = vperm.slane %v496_v61, %v1602_v51  ;;  %v614_v3 = vsel %vm448_vm5, %v613_v46, %v607_v11  ;;  %v616_v6 = vsel %vm448_vm5, %v612_v34, %v615_v27 }
 0x245   : > { %v515_v5 = vsel %vm448_vm5, %v514_v63, %v487_v0  ;;  %v620_v8 = vperm.slane %v614_v3, %v1613_v16  ;;  %v629_v10 = vsel %vm448_vm5, %v601_v45, %v594_v44  ;;  %v513_v13 = vperm.slane %v509_v62, %v1602_v51 }
 0x246   : > { %v501_v12 = vrot.slane %v500_v1, 4  ;;  %v519_v14 = vperm.slane %v515_v5, %v1602_v51  ;;  %v624_v15 = vperm.slane %v616_v6, %v1613_v16  ;;  %v633_v11 = vperm.slane %v629_v10, %v1602_v51 }
 0x247   : > { %v625_v17 = vrot.slane %v620_v8, 4  ;;  %v634_v18 = vrot.slane %v602_v59, 4  ;;  %v704_v20 = vshrl.u32 %v692_v4, 16  ;;  %v703_v26 = vpack.i.b16 %v1607_v7, %v692_v4 }
 0x248   : > { %v502_v21 = vsel %vm448_vm5, %v501_v12, %v494_v60  ;;  %v520_v22 = vrot.slane %v519_v14, 4  ;;  %v627_v25 = vrot.slane %v624_v15, 4 }
 0x249   : > { %v506_v27 = vperm.slane %v502_v21, %v1613_v16  ;;  %v635_v28 = vsel %vm448_vm5, %v634_v18, %v600_v2  ;;  %v706_v29 = vpack.i.b16 %v705_v19, %v704_v20  ;;  %v626_v31 = vsel %vm448_vm5, 0, %v625_v17 }
 0x24a   : > { %v521_v30 = vsel %vm448_vm5, %v520_v22, %v513_v13  ;;  %v628_v32 = vsel %vm448_vm5, 0, %v627_v25  ;;  %v639_v33 = vperm.slane %v635_v28, %v1602_v51  ;;  %v648_v7 = vsel %vm448_vm5, %v627_v25, %v620_v8 }
 0x24b   : > { %v507_v34 = vrot.slane %v506_v27, 4  ;;  %v525_v35 = vperm.slane %v521_v30, %v1613_v16  ;;  %v532_v36 = vshrl.u32 %v506_v27, 16  ;;  %v653_v37 = vrot.slane %v628_v32, 4 }
 0x24c   : > { %v640_v19 = vrot.slane %v639_v33, 4  ;;  %v716_v38 = vperm.slane %v703_v26, %v1602_v51  ;;  %v742_v39 = vperm.slane %v706_v29, %v1602_v51  ;;  %v652_v59 = vperm.slane %v648_v7, %v1602_v51 }
 0x24d   : > { %v508_v40 = vsel %vm448_vm5, 0, %v507_v34  ;;  %v526_v41 = vrot.slane %v525_v35, 4  ;;  %v530_v42 = vpack.i.b16 %v525_v35, %v506_v27  ;;  %v533_v43 = vshrl.u32 %v525_v35, 16 }
 0x24e   : > { %v540_v44 = vshrl.u32 %v508_v40, 16  ;;  %v641_v45 = vsel %vm448_vm5, %v640_v19, %v633_v11  ;;  %v654_v46 = vsel %vm448_vm5, %v653_v37, %v626_v31  ;;  %v717_v47 = vrot.slane %v716_v38, 4 }
 0x24f   : > { %v527_v48 = vsel %vm448_vm5, 0, %v526_v41  ;;  %v534_v49 = vpack.i.b16 %v533_v43, %v532_v36  ;;  %v1686_v50 = vperm.slane %v641_v45, %v1613_v16  ;;  %v658_v53 = vperm.slane %v654_v46, %v1602_v51  ;;  %545 = vst.msk [vmem:[%s324_s13] sm:$0xf] %vm544_vm6, %v530_v42 }
 0x250   : > { %v538_v54 = vpack.i.b16 %v527_v48, %v508_v40  ;;  %v541_v55 = vshrl.u32 %v527_v48, 16  ;;  %v718_v56 = vsel %vm448_vm5, %v717_v47, %v1610_v9  ;;  %v720_v57 = vsel %vm448_vm5, %v716_v38, %v719_v23 }
 0x251   : > { %v646_v58 = vrot.slane %v1686_v50, 4  ;;  %v659_v60 = vrot.slane %v658_v53, 4  ;;  %v724_v61 = vperm.slane %v718_v56, %v1613_v16  ;;  %546 = vst.msk [vmem:[%s324_s13 + $0x4] sm:$0xf] %vm544_vm6, %v534_v49  ;;  %v728_v63 = vperm.slane %v720_v57, %v1613_v16 }
 0x252   : > { %v542_v62 = vpack.i.b16 %v541_v55, %v540_v44  ;;  %v743_v0 = vrot.slane %v742_v39, 4  ;;  %v746_v9 = vsel %vm448_vm5, %v742_v39, %v745_v52  ;;  %547 = vst.msk [vmem:[%s324_s13 + $0x8] sm:$0xf] %vm544_vm6, %v538_v54  ;;  %v671_v4 = vshrl.u32 %v1686_v50, 16 }
 0x253   : > { %v660_v23 = vsel %vm448_vm5, %v659_v60, %v652_v59  ;;  %v729_v1 = vrot.slane %v724_v61, 4  ;;  %v754_v2 = vperm.slane %v746_v9, %v1613_v16  ;;  %v731_v5 = vrot.slane %v728_v63, 4 }
 0x254   : > { %v664_v3 = vperm.slane %v660_v23, %v1613_v16  ;;  %v744_v52 = vsel %vm448_vm5, %v743_v0, %v1619_v24  ;;  %548 = vst.msk [vmem:[%s324_s13 + $0xc] sm:$0xf] %vm544_vm6, %v542_v62  ;;  %v647_v6 = vsel %vm448_vm5, 0, %v646_v58  ;;  %s1310_s13 = scalar_lea.hbm %s1847_s4, 32 }
 0x255   : > { %v730_v8 = vsel %vm448_vm5, 0, %v729_v1  ;;  %v750_v10 = vperm.slane %v744_v52, %v1613_v16  ;;  %v757_v12 = vrot.slane %v754_v2, 4  ;;  %p1312_p12 = scmp.lt.s32.totalorder %s1310_s13, %s1306_s24 }
 0x257   : > { %p1313_p13 = por %p1312_p12, %p1311_p11 }
 0x259   : > { %p1314_p0 = pnand %p1313_p13, %p1309_p7 }
 0x25b   : > { %1317 = shalt.err (!%p1314_p0)
}
 0x25c   : > { %s1450_s7 = smov 4   ;;  %v665_v24 = vrot.slane %v664_v3, 4  ;;  %v669_v13 = vpack.i.b16 %v664_v3, %v1686_v50  ;;  %v672_v14 = vshrl.u32 %v664_v3, 16  ;;  %v732_v15 = vsel %vm448_vm5, 0, %v731_v5  ;;  %s822_s12 = sand.u32 1, %s1517_s27  }
 0x25d   : > { %1100 = dma.vmem_to_hbm [thread:$0]  (%p1560_p2), %s1707_s15, 256, %s844_s1, %s818_s11, %s1447_s16, %s1447_s16, %s1450_s7   ;;  %v755_v17 = vrot.slane %v750_v10, 4  ;;  %v758_v11 = vsel %vm448_vm5, 0, %v757_v12  ;;  %v764_v18 = vrot.slane %v732_v15, 4  ;;  %v679_v22 = vshrl.u32 %v647_v6, 16 }
 0x25e   : > { %v666_v20 = vsel %vm448_vm5, 0, %v665_v24  ;;  %v673_v21 = vpack.i.b16 %v672_v14, %v671_v4  ;;  %v759_v25 = vsel %vm448_vm5, %v731_v5, %v724_v61  ;;  %s331_s24 = scalar_lea.vmem [#allocation9], %s1664_s17  ;;  %s1756_s19 = sshll.u32 %s858_s10, 4  ;;  %v783_v31 = vrot.slane %v758_v11, 4  ;;  %s862_s19 = int_to_ptr.hbm [resolvable:$true] %s1756_s19 }
 0x25f   : > { %683 = vst.msk [vmem:[%s331_s24] sm:$0xf] %vm544_vm6, %v669_v13  ;;  %s859_s15 = sshll.u32 %s331_s24, 4  ;;  %v677_v26 = vpack.i.b16 %v666_v20, %v647_v6  ;;  %v680_v27 = vshrl.u32 %v666_v20, 16  ;;  %v756_v28 = vsel %vm448_vm5, 0, %v755_v17  ;;  %v765_v29 = vsel %vm448_vm5, %v764_v18, %v730_v8  ;;  %s1770_s27 = scalar_lea.sflag [#allocation10], %s822_s12  ;;  %s860_s15 = int_to_ptr.vmem [resolvable:$true] %s859_s15 }
 0x260   : > { %v769_v30 = vperm.slane %v765_v29, %v1602_v51  ;;  %684 = vst.msk [vmem:[%s331_s24 + $0x4] sm:$0xf] %vm544_vm6, %v673_v21  ;;  %v763_v33 = vperm.slane %v759_v25, %v1602_v51  ;;  %v778_v35 = vsel %vm448_vm5, %v757_v12, %v750_v10  ;;  %v784_v36 = vsel %vm448_vm5, %v783_v31, %v756_v28  ;;  %s1332_s10 = sshra.s32 %s862_s19, 4  ;;  %s1338_s29 = scalar_lea.hbm %s1848_s5, 32  ;;  %s1333_s10 = int_to_ptr.hbm [resolvable:$true] %s1332_s10 }
 0x261   : > { %v681_v32 = vpack.i.b16 %v680_v27, %v679_v22  ;;  %685 = vst.msk [vmem:[%s331_s24 + $0x8] sm:$0xf] %vm544_vm6, %v677_v26  ;;  %v788_v7 = vperm.slane %v784_v36, %v1602_v51  ;;  %s1334_s9 = scalar_lea.hbm %s1333_s10, 16  ;;  %p1339_p10 = scmp.lt.s32.totalorder %s1333_s10, %s1848_s5 }
 0x262   : > { %v770_v34 = vrot.slane %v769_v30, 4  ;;  %p1335_p4 = scmp.ne.s32.totalorder %s1333_s10, %s1334_s9  ;;  %p1340_p1 = scmp.lt.s32.totalorder %s1338_s29, %s1334_s9 }
 0x263   : > { %686 = vst.msk [vmem:[%s331_s24 + $0xc] sm:$0xf] %vm544_vm6, %v681_v32 }
 0x264   : > { %v771_v19 = vsel %vm448_vm5, %v770_v34, %v763_v33  ;;  %p1336_p6 = pnand %p1335_p4, %p1560_p2  ;;  %p1341_p3 = por %p1340_p1, %p1339_p10 }
 0x266   : > { %p1337_p9 = pneg %p1336_p6 }
 0x268   : > { %p1342_p7 = pnand %p1341_p3, %p1337_p9 }
 0x26a   : > { %1345 = shalt.err (!%p1342_p7)
}
 0x26b   : > { %1101 = dma.vmem_to_hbm [thread:$0]  (%p1560_p2), %s860_s15, 256, %s862_s19, %s1770_s27, %s1447_s16, %s1447_s16, %s1450_s7   ;;  %v775_v37 = vperm.slane %v771_v19, %v1613_v16  ;;  %v782_v38 = vperm.slane %v778_v35, %v1602_v51  ;;  %v789_v39 = vrot.slane %v788_v7, 4 }
 0x26c   : > { %s876_s10 = scalar_lea.hbm %s1849_s6, %s1667_s18  ;;  %s338_s19 = scalar_lea.vmem [#allocation11], %s1664_s17 }
 0x26d   : > { %v776_v40 = vrot.slane %v775_v37, 4  ;;  %v790_v41 = vsel %vm448_vm5, %v789_v39, %v782_v38  ;;  %v801_v43 = vshrl.u32 %v775_v37, 16  ;;  %s1796_s15 = sshll.u32 %s876_s10, 4  ;;  %s877_s9 = sshll.u32 %s338_s19, 4  ;;  %s878_s9 = int_to_ptr.vmem [resolvable:$true] %s877_s9  ;;  %s880_s15 = int_to_ptr.hbm [resolvable:$true] %s1796_s15 }
 0x26e   : > { %v794_v42 = vperm.slane %v790_v41, %v1613_v16  ;;  %s1360_s18 = sshra.s32 %s880_s15, 4  ;;  %s1366_s29 = scalar_lea.hbm %s1849_s6, 32  ;;  %s1361_s18 = int_to_ptr.hbm [resolvable:$true] %s1360_s18 }
 0x26f   : > { %v777_v44 = vsel %vm448_vm5, 0, %v776_v40  ;;  %s1362_s13 = scalar_lea.hbm %s1361_s18, 16  ;;  %p1367_p0 = scmp.lt.s32.totalorder %s1361_s18, %s1849_s6 }
 0x270   : > { %v795_v45 = vrot.slane %v794_v42, 4  ;;  %v799_v46 = vpack.i.b16 %v794_v42, %v775_v37  ;;  %v802_v47 = vshrl.u32 %v794_v42, 16  ;;  %v809_v16 = vshrl.u32 %v777_v44, 16  ;;  %p1363_p11 = scmp.ne.s32.totalorder %s1361_s18, %s1362_s13  ;;  %p1368_p4 = scmp.lt.s32.totalorder %s1366_s29, %s1362_s13 }
 0x272   : > { %v796_v48 = vsel %vm448_vm5, 0, %v795_v45  ;;  %v803_v49 = vpack.i.b16 %v802_v47, %v801_v43  ;;  %813 = vst.msk [vmem:[%s338_s19] sm:$0xf] %vm544_vm6, %v799_v46  ;;  %p1364_p12 = pnand %p1363_p11, %p1560_p2  ;;  %p1369_p6 = por %p1368_p4, %p1367_p0 }
 0x273   : > { %v807_v51 = vpack.i.b16 %v796_v48, %v777_v44  ;;  %v810_v50 = vshrl.u32 %v796_v48, 16 }
 0x274   : > { %814 = vst.msk [vmem:[%s338_s19 + $0x4] sm:$0xf] %vm544_vm6, %v803_v49  ;;  %p1365_p13 = pneg %p1364_p12 }
 0x275   : > { %v811_v53 = vpack.i.b16 %v810_v50, %v809_v16  ;;  %815 = vst.msk [vmem:[%s338_s19 + $0x8] sm:$0xf] %vm544_vm6, %v807_v51 }
 0x276   : > { %p1370_p9 = pnand %p1369_p6, %p1365_p13 }
 0x277   : > { %816 = vst.msk [vmem:[%s338_s19 + $0xc] sm:$0xf] %vm544_vm6, %v811_v53 }
 0x278   : > { %1373 = shalt.err (!%p1370_p9)
}
 0x279   : > { %1102 = dma.vmem_to_hbm [thread:$0]  (%p1560_p2), %s878_s9, 256, %s880_s15, %s1770_s27, %s1447_s16, %s1447_s16, %s1450_s7  }
 0x27a PF: > { %s894_s12 = sand.u32 1, %s1416_s21   ;;  %p1118_p10 = pnand %p1055_p8, %p1532_p5 }
 0x27b   : > { %s895_s24 = scalar_lea.sflag [#allocation4], %s894_s12 }
 0x27c   : > { %p1119_p1 = pneg %p1118_p10 }
 0x27e   : > { %1407 = dma.done.wait (%p1119_p1), %s895_s24, 256  }
 0x27f   : > { %1409 = vsyncadd (%p1119_p1), %s895_s24, 4294967040  ;;  %s1857_s10 = sadd.s32 4294967294, %s1436_s26  }
 0x280   : > { %s904_s8 = sand.u32 1, %s1857_s10  }
 0x281   : > { %s905_s19 = scalar_lea.sflag [#allocation10], %s904_s8 }
 0x282   : > { %1411 = dma.done.wait (%p1119_p1), %s905_s19, 512  }
 0x283   : > { %1413 = vsyncadd (%p1119_p1), %s905_s19, 4294966784  ;;  %s27_s26 = sadd.s32 1, %s1436_s26   ;;  %s1858_s21 = smov %s1420_s22 }
 0x284   : > { %p24_p2 = scmp.ge.s32.totalorder %s27_s26, 4   ;;  %s1859_s22 = smov %s1424_s23 }
 0x285   : > { %s1860_s23 = smov %s1570_s14  ;;  %s1861_s24 = smov %s1432_s25 }
 0x286   : > { %s1862_s25 = smov %s1864_s20  ;;  %26 = sbr.rel (!%p24_p2) target bundleno = 11 (0xb), region = 121 }
 0x28b   :  { %921 = vsyncpa [#allocation3], 1 }
 0x28c   :  { %923 = vsyncpa [#allocation3 + $0x1], 1 }
 0x28d   :  { %924 = vsyncpa [#allocation6], 1 }
 0x28e   :  { %925 = vsyncpa [#allocation4], 1 }
 0x28f   :  { %927 = vsyncpa [#allocation4 + $0x1], 1 }
 0x290   :  { %928 = vsyncpa [#allocation10], 1 }
 0x291   :  { %930 = vsyncpa [#allocation10 + $0x1], 1 }

</bundles_post_ra>
